<compile_context>
chip_gen: v7x
topology: tpu7x:2x2x1
jax: 0.10.0
libtpu: 0.0.40
codegen_flags: <defaults>
</compile_context>

<pallas_src>
import jax
import jax.numpy as jnp
from jax.experimental import pallas as pl
from jax.experimental.pallas import tpu as pltpu


def decoder_kernel(x_ref, h0_ref, enc_hs_ref, enc_sh_ref,
                   wg_ref, bg_ref, wc_ref, bc_ref,
                   wout_ref, bout_ref,
                   out_ref, hid_ref,
                   co_ref, m_ref, l_ref):
    j = pl.program_id(0)
    nv = pl.num_programs(0)
    B, H = h0_ref.shape
    TV = wout_ref.shape[1]
    low = x_ref.dtype                                     # bf16 storage dtype

    # ---- step 0: GRU + attention + concat layer (inputs resident, computed once) ----
    @pl.when(j == 0)
    def _():
        x = x_ref[...]                                    # (B, H) gathered embedding, bf16
        h = h0_ref[...]                                   # (B, H) f32
        # TODO(synk): embedding_dropout is identity (eval / inference mode); no RNG dropout.

        # Fused single-step GRU (PyTorch gate order r, z, n), one bf16 MXU matmul, f32 acc.
        xh = jnp.concatenate([x, h.astype(low)], axis=1)  # (B, 2H) bf16
        g = jnp.dot(xh, wg_ref[...], preferred_element_type=jnp.float32) + bg_ref[...]  # (B, 4H)
        r = jax.nn.sigmoid(g[:, 0 * H:1 * H])             # Wir x + bir + Whr h + bhr
        z = jax.nn.sigmoid(g[:, 1 * H:2 * H])             # Wiz x + biz + Whz h + bhz
        n = jnp.tanh(g[:, 2 * H:3 * H] + r * g[:, 3 * H:4 * H])   # Win x + bin + r*(Whn h + bhn)
        h_new = (1.0 - z) * n + z * h                     # (B, H) == rnn_output == new hidden
        hid_ref[...] = h_new

        # Dot attention: scores contract H on the MXU-natural layout (enc as (B, H, S)),
        # context contracts S on the MXU-natural layout (enc as (B, S, H)).
        hq = h_new.astype(low).reshape(B, 1, H)
        scores = jnp.einsum('bqh,bhs->bqs', hq, enc_hs_ref[...],
                            preferred_element_type=jnp.float32)          # (B, 1, S)
        m = jnp.max(scores, axis=2, keepdims=True)
        p = jnp.exp(scores - m)
        w = p / jnp.sum(p, axis=2, keepdims=True)                          # softmax over S (f32)
        ctx = jnp.einsum('bqs,bsh->bqh', w.astype(low), enc_sh_ref[...],
                         preferred_element_type=jnp.float32).reshape(B, H)

        # concat Linear(2H -> H) as a single fused bf16 matmul, then tanh.
        cat = jnp.concatenate([h_new, ctx], axis=1).astype(low)           # (B, 2H) bf16
        co_ref[...] = jnp.tanh(
            jnp.dot(cat, wc_ref[...], preferred_element_type=jnp.float32) + bc_ref[...])

        # online-softmax running stats over vocab tiles
        m_ref[...] = jnp.full_like(m_ref, -jnp.inf)
        l_ref[...] = jnp.zeros_like(l_ref)

    # ---- every step: one vocab tile of the output projection (wout DMA pipelines) ----
    off = pl.multiple_of(j * TV, TV)
    logits = (jnp.dot(co_ref[...].astype(low), wout_ref[...],
                      preferred_element_type=jnp.float32)
              + bout_ref[:, pl.ds(off, TV)])              # (B, TV); bout resident, sliced
    out_ref[:, pl.ds(off, TV)] = logits                   # (B, V_pad) block resident in VMEM

    # running max / sum so the final pass is a single rescale (no second max pass over V)
    m_prev = m_ref[...]
    m_new = jnp.maximum(m_prev, jnp.max(logits, axis=1, keepdims=True))
    l_ref[...] = (l_ref[...] * jnp.exp(m_prev - m_new)
                  + jnp.sum(jnp.exp(logits - m_new), axis=1, keepdims=True))
    m_ref[...] = m_new

    # ---- last step: one exp + scale pass over the resident (B, V_pad) logit block ----
    @pl.when(j == nv - 1)
    def _():
        out_ref[...] = jnp.exp(out_ref[...] - m_ref[...]) / l_ref[...]


def init_params(key, vocab, hidden):
    ks = jax.random.split(key, 16)
    s = 0.1
    return {
        "emb":  jax.random.normal(ks[0], (vocab, hidden), jnp.float32) * s,
        # GRU weights stored pre-transposed (in, out) so that x @ W.
        "wir":  jax.random.normal(ks[1], (hidden, hidden), jnp.float32) * s,
        "wiz":  jax.random.normal(ks[2], (hidden, hidden), jnp.float32) * s,
        "win":  jax.random.normal(ks[3], (hidden, hidden), jnp.float32) * s,
        "whr":  jax.random.normal(ks[4], (hidden, hidden), jnp.float32) * s,
        "whz":  jax.random.normal(ks[5], (hidden, hidden), jnp.float32) * s,
        "whn":  jax.random.normal(ks[6], (hidden, hidden), jnp.float32) * s,
        "bir":  jax.random.normal(ks[7], (1, hidden), jnp.float32) * s,
        "biz":  jax.random.normal(ks[8], (1, hidden), jnp.float32) * s,
        "bin":  jax.random.normal(ks[9], (1, hidden), jnp.float32) * s,
        "bhr":  jax.random.normal(ks[10], (1, hidden), jnp.float32) * s,
        "bhz":  jax.random.normal(ks[11], (1, hidden), jnp.float32) * s,
        "bhn":  jax.random.normal(ks[12], (1, hidden), jnp.float32) * s,
        # concat Linear(2H -> H): first half multiplies rnn_output, second half context.
        "wcr":  jax.random.normal(ks[13], (hidden, hidden), jnp.float32) * s,
        "wcc":  jax.random.normal(ks[14], (hidden, hidden), jnp.float32) * s,
        "bc":   jnp.zeros((1, hidden), jnp.float32),
        "wout": jax.random.normal(ks[15], (hidden, vocab), jnp.float32) * s,
        "bout": jnp.zeros((1, vocab), jnp.float32),
    }


def pack_params(p, low=jnp.bfloat16):
    """Host-side one-time packing of the fused GRU / concat weights (weights in bf16)."""
    H = p["wir"].shape[0]
    zeros = jnp.zeros((H, H), jnp.float32)
    w_i = jnp.concatenate([p["wir"], p["wiz"], p["win"], zeros], axis=1)    # (H, 4H)
    w_h = jnp.concatenate([p["whr"], p["whz"], zeros, p["whn"]], axis=1)    # (H, 4H)
    return {
        "emb":   p["emb"].astype(low),
        "w_gru": jnp.concatenate([w_i, w_h], axis=0).astype(low),           # (2H, 4H)
        "b_gru": jnp.concatenate([p["bir"] + p["bhr"], p["biz"] + p["bhz"],
                                  p["bin"], p["bhn"]], axis=1),             # (1, 4H) f32
        "w_cat": jnp.concatenate([p["wcr"], p["wcc"]], axis=0).astype(low), # (2H, H)
        "b_cat": p["bc"],
        "wout":  p["wout"].astype(low),
        "bout":  p["bout"],
    }


@jax.jit
def luong_attn_decoder_forward(packed, input_step, last_hidden, encoder_outputs):
    S, B, H = encoder_outputs.shape
    V = packed["wout"].shape[1]
    low = packed["wout"].dtype

    # Pad V to a lane-dense multiple of 128; single big vocab tile (capped at 2048 for huge V).
    V_pad = ((V + 127) // 128) * 128
    tv = V_pad if V_pad <= 2048 else 2048
    V_pad = ((V_pad + tv - 1) // tv) * tv
    nv = V_pad // tv

    wout = packed["wout"]
    bout = packed["bout"]
    if V_pad != V:
        wout = jnp.pad(wout, ((0, 0), (0, V_pad - V)))
        bout = jnp.pad(bout, ((0, 0), (0, V_pad - V)), constant_values=-1e30)

    # Embedding gather in the wrapper: only B rows of the (V, H) table are read.
    x = jnp.take(packed["emb"], input_step[0].astype(jnp.int32), axis=0)    # (B, H) bf16
    h0 = last_hidden[0]                                                     # (B, H) f32
    enc_bhs = jnp.transpose(encoder_outputs, (1, 2, 0)).astype(low)         # (B, H, S) for scores
    enc_bsh = jnp.transpose(encoder_outputs, (1, 0, 2)).astype(low)         # (B, S, H) for context

    const2 = lambda j: (0, 0)
    const3 = lambda j: (0, 0, 0)

    grid_spec = pltpu.PrefetchScalarGridSpec(
        num_scalar_prefetch=0,
        grid=(nv,),
        in_specs=[
            pl.BlockSpec((B, H), const2),              # x (gathered embedding, bf16)
            pl.BlockSpec((B, H), const2),              # h0 (f32)
            pl.BlockSpec((B, H, S), const3),           # enc (B, H, S) for scores
            pl.BlockSpec((B, S, H), const3),           # enc (B, S, H) for context
            pl.BlockSpec((2 * H, 4 * H), const2),      # fused GRU weight (bf16)
            pl.BlockSpec((1, 4 * H), const2),          # fused GRU bias (f32)
            pl.BlockSpec((2 * H, H), const2),          # fused concat weight (bf16)
            pl.BlockSpec((1, H), const2),              # concat bias (f32)
            pl.BlockSpec((H, tv), lambda j: (0, j)),   # wout vocab tile (pipelined DMA, bf16)
            pl.BlockSpec((1, V_pad), const2),          # bout resident (one DMA total)
        ],
        out_specs=(
            pl.BlockSpec((B, V_pad), const2),          # probs: resident accumulator block
            pl.BlockSpec((B, H), const2),              # new hidden
        ),
        scratch_shapes=[pltpu.VMEM((B, H), jnp.float32),   # concat_output, persists over V tiles
                        pltpu.VMEM((B, 1), jnp.float32),   # running max
                        pltpu.VMEM((B, 1), jnp.float32)],  # running sum
    )

    out, h_new = pl.pallas_call(
        decoder_kernel,
        grid_spec=grid_spec,
        out_shape=(jax.ShapeDtypeStruct((B, V_pad), jnp.float32),
                   jax.ShapeDtypeStruct((B, H), jnp.float32)),
        input_output_aliases={1: 1},    # h0 buffer reused for the new hidden state
        compiler_params=pltpu.CompilerParams(
            dimension_semantics=("arbitrary",),        # vocab axis carries the resident out block
            vmem_limit_bytes=32 * 1024 * 1024),
    )(x, h0, enc_bhs, enc_bsh,
      packed["w_gru"], packed["b_gru"], packed["w_cat"], packed["b_cat"],
      wout, bout)
    return out[:, :V], h_new.reshape(1, B, H)


def reference_forward(raw, input_step, last_hidden, encoder_outputs, low=None):
    """Pure-JAX reference (PyTorch semantics, eval mode).

    If `low` is set, weights / encoder outputs and the activations feeding each matmul are
    rounded through that dtype, mirroring the kernel's bf16-storage / f32-accumulation scheme.
    """
    c = (lambda a: a) if low is None else (lambda a: a.astype(low).astype(jnp.float32))
    x = c(raw["emb"])[input_step[0]]                      # (B, H)
    h = last_hidden[0]
    xq, hq = c(x), c(h)
    gi_r = xq @ c(raw["wir"]) + raw["bir"]
    gi_z = xq @ c(raw["wiz"]) + raw["biz"]
    gi_n = xq @ c(raw["win"]) + raw["bin"]
    gh_r = hq @ c(raw["whr"]) + raw["bhr"]
    gh_z = hq @ c(raw["whz"]) + raw["bhz"]
    gh_n = hq @ c(raw["whn"]) + raw["bhn"]
    r = jax.nn.sigmoid(gi_r + gh_r)
    z = jax.nn.sigmoid(gi_z + gh_z)
    n = jnp.tanh(gi_n + r * gh_n)
    h_new = (1.0 - z) * n + z * h
    enc = c(encoder_outputs)
    scores = jnp.sum(c(h_new)[None] * enc, axis=2)        # (S, B)
    w = jax.nn.softmax(scores.T, axis=1)                  # (B, S)
    ctx = jnp.einsum("bs,sbh->bh", c(w), enc)
    concat_out = jnp.tanh(c(h_new) @ c(raw["wcr"]) + c(ctx) @ c(raw["wcc"]) + raw["bc"])
    out = jax.nn.softmax(c(concat_out) @ c(raw["wout"]) + raw["bout"], axis=1)
    return out, h_new.reshape(1, *h_new.shape)


if __name__ == "__main__":
    # hardware-friendly toy shapes: B multiple of 8 (sublane), H/V multiples of 128 (lane)
    B, H, S, V = 8, 128, 8, 256          # batch, hidden, max_len, vocab/output_size
    key = jax.random.PRNGKey(0)
    kp, ki, kh, ke = jax.random.split(key, 4)

    raw = init_params(kp, V, H)
    packed = pack_params(raw)
    input_step = jax.random.randint(ki, (1, B), 0, V, dtype=jnp.int32)      # (1, B)
    last_hidden = jax.random.normal(kh, (1, B, H), jnp.float32)             # (n_layers, B, H)
    encoder_outputs = jax.random.normal(ke, (S, B, H), jnp.float32)         # (S, B, H)

    out, hidden = luong_attn_decoder_forward(packed, input_step, last_hidden, encoder_outputs)
    out = jax.block_until_ready(out)
    hidden = jax.block_until_ready(hidden)

    # Tight check vs a reference that mirrors bf16 storage / f32 accumulation.
    ref_lo_out, ref_lo_hid = reference_forward(raw, input_step, last_hidden, encoder_outputs,
                                               low=jnp.bfloat16)
    # Loose semantic check vs the full-f32 PyTorch-faithful reference (bf16 quantization noise).
    ref_f32_out, ref_f32_hid = reference_forward(raw, input_step, last_hidden, encoder_outputs)

    assert out.shape == (B, V) and hidden.shape == (1, B, H)
    assert jnp.allclose(out, ref_lo_out, atol=1e-3, rtol=1e-3)
    assert jnp.allclose(hidden, ref_lo_hid, atol=1e-3, rtol=1e-3)
    assert jnp.allclose(out, ref_f32_out, atol=5e-2)
    assert jnp.allclose(hidden, ref_f32_hid, atol=5e-2)
    assert jnp.allclose(jnp.sum(out, axis=1), 1.0, atol=1e-3)

    print("KERNEL_OK")
</pallas_src>

<mosaic_0001>
module attributes {stable_mosaic.version = 11 : i64} {
  func.func @decoder_kernel(%arg0: i32, %arg1: memref<8x128xbf16, #tpu.memory_space<vmem>>, %arg2: memref<8x128xf32, #tpu.memory_space<vmem>>, %arg3: memref<8x128x8xbf16, #tpu.memory_space<vmem>>, %arg4: memref<8x8x128xbf16, #tpu.memory_space<vmem>>, %arg5: memref<256x512xbf16, #tpu.memory_space<vmem>>, %arg6: memref<1x512xf32, #tpu.memory_space<vmem>>, %arg7: memref<256x128xbf16, #tpu.memory_space<vmem>>, %arg8: memref<1x128xf32, #tpu.memory_space<vmem>>, %arg9: memref<128x256xbf16, #tpu.memory_space<vmem>>, %arg10: memref<1x256xf32, #tpu.memory_space<vmem>>, %arg11: memref<8x256xf32, #tpu.memory_space<vmem>>, %arg12: memref<8x128xf32, #tpu.memory_space<vmem>>, %arg13: memref<8x128xf32, #tpu.memory_space<vmem>>, %arg14: memref<8x1xf32, #tpu.memory_space<vmem>>, %arg15: memref<8x1xf32, #tpu.memory_space<vmem>>) attributes {dimension_semantics = [#tpu.dimension_semantics<arbitrary>], iteration_bounds = array<i64: 1>, scalar_prefetch = 0 : i64, scratch_operands = 3 : i64, tpu.core_type = #tpu.core_type<tc>, window_params = [{pipeline_mode = #tpu.pipeline_mode<synchronous>, transform_indices = @transform_0, window_bounds = array<i64: 8, 128>}, {pipeline_mode = #tpu.pipeline_mode<synchronous>, transform_indices = @transform_1, window_bounds = array<i64: 8, 128>}, {pipeline_mode = #tpu.pipeline_mode<synchronous>, transform_indices = @transform_2, window_bounds = array<i64: 8, 128, 8>}, {pipeline_mode = #tpu.pipeline_mode<synchronous>, transform_indices = @transform_3, window_bounds = array<i64: 8, 8, 128>}, {pipeline_mode = #tpu.pipeline_mode<synchronous>, transform_indices = @transform_4, window_bounds = array<i64: 256, 512>}, {pipeline_mode = #tpu.pipeline_mode<synchronous>, transform_indices = @transform_5, window_bounds = array<i64: 1, 512>}, {pipeline_mode = #tpu.pipeline_mode<synchronous>, transform_indices = @transform_6, window_bounds = array<i64: 256, 128>}, {pipeline_mode = #tpu.pipeline_mode<synchronous>, transform_indices = @transform_7, window_bounds = array<i64: 1, 128>}, {transform_indices = @transform_8, window_bounds = array<i64: 128, 256>}, {pipeline_mode = #tpu.pipeline_mode<synchronous>, transform_indices = @transform_9, window_bounds = array<i64: 1, 256>}, {pipeline_mode = #tpu.pipeline_mode<synchronous>, transform_indices = @transform_10, window_bounds = array<i64: 8, 256>}, {pipeline_mode = #tpu.pipeline_mode<synchronous>, transform_indices = @transform_11, window_bounds = array<i64: 8, 128>}]} {
    %c0_i32 = arith.constant 0 : i32
    %0 = arith.cmpi eq, %arg0, %c0_i32 : i32
    %1 = arith.extui %0 : i1 to i32
    %c0_i32_0 = arith.constant 0 : i32
    %2 = arith.cmpi ne, %1, %c0_i32_0 : i32
    scf.if %2 {
      %c0_18 = arith.constant 0 : index
      %c0_19 = arith.constant 0 : index
      %34 = vector.load %arg1[%c0_18, %c0_19] : memref<8x128xbf16, #tpu.memory_space<vmem>>, vector<8x128xbf16>
      %c0_20 = arith.constant 0 : index
      %c0_21 = arith.constant 0 : index
      %35 = vector.load %arg2[%c0_20, %c0_21] : memref<8x128xf32, #tpu.memory_space<vmem>>, vector<8x128xf32>
      %36 = arith.truncf %35 : vector<8x128xf32> to vector<8x128xbf16>
      %37 = tpu.concatenate %34, %36 in 1 : vector<8x128xbf16>, vector<8x128xbf16> -> vector<8x256xbf16>
      %c0_22 = arith.constant 0 : index
      %c0_23 = arith.constant 0 : index
      %38 = vector.load %arg5[%c0_22, %c0_23] : memref<256x512xbf16, #tpu.memory_space<vmem>>, vector<256x512xbf16>
      %cst_24 = arith.constant dense<0.000000e+00> : vector<8x512xf32>
      %39 = tpu.matmul %37, %38, %cst_24 {dimension_numbers = #tpu.dot_dimension_numbers<[1], [0], [0], [1], [0, 0, 1, 1], [], []>} : vector<8x256xbf16>, vector<256x512xbf16>, vector<8x512xf32> -> vector<8x512xf32>
      %c0_25 = arith.constant 0 : index
      %c0_26 = arith.constant 0 : index
      %40 = vector.load %arg6[%c0_25, %c0_26] : memref<1x512xf32, #tpu.memory_space<vmem>>, vector<1x512xf32>
      %41 = vector.broadcast %40 : vector<1x512xf32> to vector<8x512xf32>
      %42 = arith.addf %39, %41 : vector<8x512xf32>
      %43 = vector.extract_strided_slice %42 {offsets = [0, 0], sizes = [8, 128], strides = [1, 1]} : vector<8x512xf32> to vector<8x128xf32>
      %44 = arith.negf %43 : vector<8x128xf32>
      %45 = math.exp %44 : vector<8x128xf32>
      %cst_27 = arith.constant 1.000000e+00 : f32
      %46 = vector.broadcast %cst_27 : f32 to vector<8x128xf32>
      %47 = arith.addf %46, %45 : vector<8x128xf32>
      %48 = arith.divf %46, %47 : vector<8x128xf32>
      %49 = vector.extract_strided_slice %42 {offsets = [0, 128], sizes = [8, 128], strides = [1, 1]} : vector<8x512xf32> to vector<8x128xf32>
      %50 = arith.negf %49 : vector<8x128xf32>
      %51 = math.exp %50 : vector<8x128xf32>
      %cst_28 = arith.constant 1.000000e+00 : f32
      %52 = vector.broadcast %cst_28 : f32 to vector<8x128xf32>
      %53 = arith.addf %52, %51 : vector<8x128xf32>
      %54 = arith.divf %52, %53 : vector<8x128xf32>
      %55 = vector.extract_strided_slice %42 {offsets = [0, 256], sizes = [8, 128], strides = [1, 1]} : vector<8x512xf32> to vector<8x128xf32>
      %56 = vector.extract_strided_slice %42 {offsets = [0, 384], sizes = [8, 128], strides = [1, 1]} : vector<8x512xf32> to vector<8x128xf32>
      %57 = arith.mulf %48, %56 : vector<8x128xf32>
      %58 = arith.addf %55, %57 : vector<8x128xf32>
      %59 = math.tanh %58 : vector<8x128xf32>
      %cst_29 = arith.constant 1.000000e+00 : f32
      %60 = vector.broadcast %cst_29 : f32 to vector<8x128xf32>
      %61 = arith.subf %60, %54 : vector<8x128xf32>
      %62 = arith.mulf %61, %59 : vector<8x128xf32>
      %63 = arith.mulf %54, %35 : vector<8x128xf32>
      %64 = arith.addf %62, %63 : vector<8x128xf32>
      %c0_30 = arith.constant 0 : index
      %c0_31 = arith.constant 0 : index
      %65 = vector.load %arg12[%c0_30, %c0_31] : memref<8x128xf32, #tpu.memory_space<vmem>>, vector<8x128xf32>
      tpu.vector_store %arg12[%c0_30, %c0_31], %64 {strides = array<i32>} : memref<8x128xf32, #tpu.memory_space<vmem>>, vector<8x128xf32>,
      %66 = arith.truncf %64 : vector<8x128xf32> to vector<8x128xbf16>
      %67 = vector.shape_cast %66 : vector<8x128xbf16> to vector<8x1x128xbf16>
      %c0_32 = arith.constant 0 : index
      %c0_33 = arith.constant 0 : index
      %c0_34 = arith.constant 0 : index
      %68 = vector.load %arg3[%c0_32, %c0_33, %c0_34] : memref<8x128x8xbf16, #tpu.memory_space<vmem>>, vector<8x128x8xbf16>
      "tpu.trace_start"() <{level = 10 : i32, message = "bqh,bhs->bqs"}> : () -> ()
      %cst_35 = arith.constant dense<0.000000e+00> : vector<8x1x8xf32>
      %69 = tpu.matmul %67, %68, %cst_35 {dimension_numbers = #tpu.dot_dimension_numbers<[2], [1], [1], [2], [0, 0, 0, 1, 1, 2], [0], [0]>} : vector<8x1x128xbf16>, vector<8x128x8xbf16>, vector<8x1x8xf32> -> vector<8x1x8xf32>
      "tpu.trace_stop"() : () -> ()
      %cst_36 = arith.constant dense<0xFF800000> : vector<8x1xf32>
      %70 = vector.multi_reduction <maximumf>, %69, %cst_36 [2] : vector<8x1x8xf32> to vector<8x1xf32>
      %71 = vector.shape_cast %70 : vector<8x1xf32> to vector<8x1x1xf32>
      %72 = vector.broadcast %71 : vector<8x1x1xf32> to vector<8x1x8xf32>
      %73 = arith.subf %69, %72 : vector<8x1x8xf32>
      %74 = math.exp %73 : vector<8x1x8xf32>
      %cst_37 = arith.constant dense<0.000000e+00> : vector<8x1xf32>
      %75 = vector.multi_reduction <add>, %74, %cst_37 [2] : vector<8x1x8xf32> to vector<8x1xf32>
      %76 = vector.shape_cast %75 : vector<8x1xf32> to vector<8x1x1xf32>
      %77 = vector.broadcast %76 : vector<8x1x1xf32> to vector<8x1x8xf32>
      %78 = arith.divf %74, %77 : vector<8x1x8xf32>
      %79 = arith.truncf %78 : vector<8x1x8xf32> to vector<8x1x8xbf16>
      %c0_38 = arith.constant 0 : index
      %c0_39 = arith.constant 0 : index
      %c0_40 = arith.constant 0 : index
      %80 = vector.load %arg4[%c0_38, %c0_39, %c0_40] : memref<8x8x128xbf16, #tpu.memory_space<vmem>>, vector<8x8x128xbf16>
      "tpu.trace_start"() <{level = 10 : i32, message = "bqs,bsh->bqh"}> : () -> ()
      %cst_41 = arith.constant dense<0.000000e+00> : vector<8x1x128xf32>
      %81 = tpu.matmul %79, %80, %cst_41 {dimension_numbers = #tpu.dot_dimension_numbers<[2], [1], [1], [2], [0, 0, 0, 1, 1, 2], [0], [0]>} : vector<8x1x8xbf16>, vector<8x8x128xbf16>, vector<8x1x128xf32> -> vector<8x1x128xf32>
      "tpu.trace_stop"() : () -> ()
      %82 = vector.shape_cast %81 : vector<8x1x128xf32> to vector<8x128xf32>
      %83 = tpu.concatenate %64, %82 in 1 : vector<8x128xf32>, vector<8x128xf32> -> vector<8x256xf32>
      %84 = arith.truncf %83 : vector<8x256xf32> to vector<8x256xbf16>
      %c0_42 = arith.constant 0 : index
      %c0_43 = arith.constant 0 : index
      %85 = vector.load %arg7[%c0_42, %c0_43] : memref<256x128xbf16, #tpu.memory_space<vmem>>, vector<256x128xbf16>
      %cst_44 = arith.constant dense<0.000000e+00> : vector<8x128xf32>
      %86 = tpu.matmul %84, %85, %cst_44 {dimension_numbers = #tpu.dot_dimension_numbers<[1], [0], [0], [1], [0, 0, 1, 1], [], []>} : vector<8x256xbf16>, vector<256x128xbf16>, vector<8x128xf32> -> vector<8x128xf32>
      %c0_45 = arith.constant 0 : index
      %c0_46 = arith.constant 0 : index
      %87 = vector.load %arg8[%c0_45, %c0_46] : memref<1x128xf32, #tpu.memory_space<vmem>>, vector<1x128xf32>
      %88 = vector.broadcast %87 : vector<1x128xf32> to vector<8x128xf32>
      %89 = arith.addf %86, %88 : vector<8x128xf32>
      %90 = math.tanh %89 : vector<8x128xf32>
      %c0_47 = arith.constant 0 : index
      %c0_48 = arith.constant 0 : index
      %91 = vector.load %arg13[%c0_47, %c0_48] : memref<8x128xf32, #tpu.memory_space<vmem>>, vector<8x128xf32>
      tpu.vector_store %arg13[%c0_47, %c0_48], %90 {strides = array<i32>} : memref<8x128xf32, #tpu.memory_space<vmem>>, vector<8x128xf32>,
      %cst_49 = arith.constant 0xFF800000 : f32
      %92 = vector.broadcast %cst_49 : f32 to vector<8x1xf32>
      %c0_50 = arith.constant 0 : index
      %c0_51 = arith.constant 0 : index
      %93 = vector.load %arg14[%c0_50, %c0_51] : memref<8x1xf32, #tpu.memory_space<vmem>>, vector<8x1xf32>
      tpu.vector_store %arg14[%c0_50, %c0_51], %92 {strides = array<i32>} : memref<8x1xf32, #tpu.memory_space<vmem>>, vector<8x1xf32>,
      %cst_52 = arith.constant 0.000000e+00 : f32
      %94 = vector.broadcast %cst_52 : f32 to vector<8x1xf32>
      %c0_53 = arith.constant 0 : index
      %c0_54 = arith.constant 0 : index
      %95 = vector.load %arg15[%c0_53, %c0_54] : memref<8x1xf32, #tpu.memory_space<vmem>>, vector<8x1xf32>
      tpu.vector_store %arg15[%c0_53, %c0_54], %94 {strides = array<i32>} : memref<8x1xf32, #tpu.memory_space<vmem>>, vector<8x1xf32>,
    } else {
    }
    %c256_i32 = arith.constant 256 : i32
    %3 = arith.muli %arg0, %c256_i32 : i32
    %4 = tpu.assume_multiple %3, 256 : i32
    %c0 = arith.constant 0 : index
    %c0_1 = arith.constant 0 : index
    %5 = vector.load %arg13[%c0, %c0_1] : memref<8x128xf32, #tpu.memory_space<vmem>>, vector<8x128xf32>
    %6 = arith.truncf %5 : vector<8x128xf32> to vector<8x128xbf16>
    %c0_2 = arith.constant 0 : index
    %c0_3 = arith.constant 0 : index
    %7 = vector.load %arg9[%c0_2, %c0_3] : memref<128x256xbf16, #tpu.memory_space<vmem>>, vector<128x256xbf16>
    %cst = arith.constant dense<0.000000e+00> : vector<8x256xf32>
    %8 = tpu.matmul %6, %7, %cst {dimension_numbers = #tpu.dot_dimension_numbers<[1], [0], [0], [1], [0, 0, 1, 1], [], []>} : vector<8x128xbf16>, vector<128x256xbf16>, vector<8x256xf32> -> vector<8x256xf32>
    %c0_4 = arith.constant 0 : index
    %9 = arith.index_cast %4 : i32 to index
    %10 = vector.load %arg10[%c0_4, %9] : memref<1x256xf32, #tpu.memory_space<vmem>>, vector<1x256xf32>
    %11 = vector.broadcast %10 : vector<1x256xf32> to vector<8x256xf32>
    %12 = arith.addf %8, %11 : vector<8x256xf32>
    %c0_5 = arith.constant 0 : index
    %13 = arith.index_cast %4 : i32 to index
    %14 = vector.load %arg11[%c0_5, %13] : memref<8x256xf32, #tpu.memory_space<vmem>>, vector<8x256xf32>
    tpu.vector_store %arg11[%c0_5, %13], %12 {strides = array<i32>} : memref<8x256xf32, #tpu.memory_space<vmem>>, vector<8x256xf32>,
    %c0_6 = arith.constant 0 : index
    %c0_7 = arith.constant 0 : index
    %15 = vector.load %arg14[%c0_6, %c0_7] : memref<8x1xf32, #tpu.memory_space<vmem>>, vector<8x1xf32>
    %cst_8 = arith.constant dense<0xFF800000> : vector<8xf32>
    %16 = vector.multi_reduction <maximumf>, %12, %cst_8 [1] : vector<8x256xf32> to vector<8xf32>
    %17 = vector.shape_cast %16 : vector<8xf32> to vector<8x1xf32>
    %18 = arith.maximumf %15, %17 : vector<8x1xf32>
    %c0_9 = arith.constant 0 : index
    %c0_10 = arith.constant 0 : index
    %19 = vector.load %arg15[%c0_9, %c0_10] : memref<8x1xf32, #tpu.memory_space<vmem>>, vector<8x1xf32>
    %20 = arith.subf %15, %18 : vector<8x1xf32>
    %21 = math.exp %20 : vector<8x1xf32>
    %22 = arith.mulf %19, %21 : vector<8x1xf32>
    %23 = vector.broadcast %18 : vector<8x1xf32> to vector<8x256xf32>
    %24 = arith.subf %12, %23 : vector<8x256xf32>
    %25 = math.exp %24 : vector<8x256xf32>
    %cst_11 = arith.constant dense<0.000000e+00> : vector<8xf32>
    %26 = vector.multi_reduction <add>, %25, %cst_11 [1] : vector<8x256xf32> to vector<8xf32>
    %27 = vector.shape_cast %26 : vector<8xf32> to vector<8x1xf32>
    %28 = arith.addf %22, %27 : vector<8x1xf32>
    %c0_12 = arith.constant 0 : index
    %c0_13 = arith.constant 0 : index
    %29 = vector.load %arg15[%c0_12, %c0_13] : memref<8x1xf32, #tpu.memory_space<vmem>>, vector<8x1xf32>
    tpu.vector_store %arg15[%c0_12, %c0_13], %28 {strides = array<i32>} : memref<8x1xf32, #tpu.memory_space<vmem>>, vector<8x1xf32>,
    %c0_14 = arith.constant 0 : index
    %c0_15 = arith.constant 0 : index
    %30 = vector.load %arg14[%c0_14, %c0_15] : memref<8x1xf32, #tpu.memory_space<vmem>>, vector<8x1xf32>
    tpu.vector_store %arg14[%c0_14, %c0_15], %18 {strides = array<i32>} : memref<8x1xf32, #tpu.memory_space<vmem>>, vector<8x1xf32>,
    %c0_i32_16 = arith.constant 0 : i32
    %31 = arith.cmpi eq, %arg0, %c0_i32_16 : i32
    %32 = arith.extui %31 : i1 to i32
    %c0_i32_17 = arith.constant 0 : i32
    %33 = arith.cmpi ne, %32, %c0_i32_17 : i32
    scf.if %33 {
      %c0_18 = arith.constant 0 : index
      %c0_19 = arith.constant 0 : index
      %34 = vector.load %arg11[%c0_18, %c0_19] : memref<8x256xf32, #tpu.memory_space<vmem>>, vector<8x256xf32>
      %c0_20 = arith.constant 0 : index
      %c0_21 = arith.constant 0 : index
      %35 = vector.load %arg14[%c0_20, %c0_21] : memref<8x1xf32, #tpu.memory_space<vmem>>, vector<8x1xf32>
      %36 = vector.broadcast %35 : vector<8x1xf32> to vector<8x256xf32>
      %37 = arith.subf %34, %36 : vector<8x256xf32>
      %38 = math.exp %37 : vector<8x256xf32>
      %c0_22 = arith.constant 0 : index
      %c0_23 = arith.constant 0 : index
      %39 = vector.load %arg15[%c0_22, %c0_23] : memref<8x1xf32, #tpu.memory_space<vmem>>, vector<8x1xf32>
      %40 = vector.broadcast %39 : vector<8x1xf32> to vector<8x256xf32>
      %41 = arith.divf %38, %40 : vector<8x256xf32>
      %c0_24 = arith.constant 0 : index
      %c0_25 = arith.constant 0 : index
      %42 = vector.load %arg11[%c0_24, %c0_25] : memref<8x256xf32, #tpu.memory_space<vmem>>, vector<8x256xf32>
      tpu.vector_store %arg11[%c0_24, %c0_25], %41 {strides = array<i32>} : memref<8x256xf32, #tpu.memory_space<vmem>>, vector<8x256xf32>,
    } else {
    }
    return
  }
  func.func @transform_0(%arg0: i32) -> (i32, i32) {
    %c0_i32 = arith.constant 0 : i32
    %c0_i32_0 = arith.constant 0 : i32
    %c0_i32_1 = arith.constant 0 : i32
    return %c0_i32, %c0_i32_0 : i32, i32
  }
  func.func @transform_1(%arg0: i32) -> (i32, i32) {
    %c0_i32 = arith.constant 0 : i32
    %c0_i32_0 = arith.constant 0 : i32
    %c0_i32_1 = arith.constant 0 : i32
    return %c0_i32, %c0_i32_0 : i32, i32
  }
  func.func @transform_2(%arg0: i32) -> (i32, i32, i32) {
    %c0_i32 = arith.constant 0 : i32
    %c0_i32_0 = arith.constant 0 : i32
    %c0_i32_1 = arith.constant 0 : i32
    %c0_i32_2 = arith.constant 0 : i32
    return %c0_i32, %c0_i32_0, %c0_i32_1 : i32, i32, i32
  }
  func.func @transform_3(%arg0: i32) -> (i32, i32, i32) {
    %c0_i32 = arith.constant 0 : i32
    %c0_i32_0 = arith.constant 0 : i32
    %c0_i32_1 = arith.constant 0 : i32
    %c0_i32_2 = arith.constant 0 : i32
    return %c0_i32, %c0_i32_0, %c0_i32_1 : i32, i32, i32
  }
  func.func @transform_4(%arg0: i32) -> (i32, i32) {
    %c0_i32 = arith.constant 0 : i32
    %c0_i32_0 = arith.constant 0 : i32
    %c0_i32_1 = arith.constant 0 : i32
    return %c0_i32, %c0_i32_0 : i32, i32
  }
  func.func @transform_5(%arg0: i32) -> (i32, i32) {
    %c0_i32 = arith.constant 0 : i32
    %c0_i32_0 = arith.constant 0 : i32
    %c0_i32_1 = arith.constant 0 : i32
    return %c0_i32, %c0_i32_0 : i32, i32
  }
  func.func @transform_6(%arg0: i32) -> (i32, i32) {
    %c0_i32 = arith.constant 0 : i32
    %c0_i32_0 = arith.constant 0 : i32
    %c0_i32_1 = arith.constant 0 : i32
    return %c0_i32, %c0_i32_0 : i32, i32
  }
  func.func @transform_7(%arg0: i32) -> (i32, i32) {
    %c0_i32 = arith.constant 0 : i32
    %c0_i32_0 = arith.constant 0 : i32
    %c0_i32_1 = arith.constant 0 : i32
    return %c0_i32, %c0_i32_0 : i32, i32
  }
  func.func @transform_8(%arg0: i32) -> (i32, i32) {
    %c0_i32 = arith.constant 0 : i32
    %c0_i32_0 = arith.constant 0 : i32
    return %c0_i32, %arg0 : i32, i32
  }
  func.func @transform_9(%arg0: i32) -> (i32, i32) {
    %c0_i32 = arith.constant 0 : i32
    %c0_i32_0 = arith.constant 0 : i32
    %c0_i32_1 = arith.constant 0 : i32
    return %c0_i32, %c0_i32_0 : i32, i32
  }
  func.func @transform_10(%arg0: i32) -> (i32, i32) {
    %c0_i32 = arith.constant 0 : i32
    %c0_i32_0 = arith.constant 0 : i32
    %c0_i32_1 = arith.constant 0 : i32
    return %c0_i32, %c0_i32_0 : i32, i32
  }
  func.func @transform_11(%arg0: i32) -> (i32, i32) {
    %c0_i32 = arith.constant 0 : i32
    %c0_i32_0 = arith.constant 0 : i32
    %c0_i32_1 = arith.constant 0 : i32
    return %c0_i32, %c0_i32_0 : i32, i32
  }
}

</mosaic_0001>

<bundles_post_ra>
// kernel: luong_attn_decoder_forward.1
= control target key start
LH: loop header
LB: loop body
LE: loop exit
PB: predicated region body
PF: predicated region fallthrough
CT: control target
= control target key end

     0   :  { %s4002_s0 = inlined_call_operand.vmem [shape: bf16[8,128], index: 0, kind: input, shape index: {}]   ;;  %s4003_s1 = inlined_call_operand.vmem [shape: f32[8,128], index: 1, kind: input, shape index: {}, may-alias: {1,11}]   ;;  %s4004_s2 = inlined_call_operand.vmem [shape: bf16[8,128,8], index: 2, kind: input, shape index: {}]   ;;  %s4005_s3 = inlined_call_operand.vmem [shape: bf16[8,8,128], index: 3, kind: input, shape index: {}]   ;;  %s4006_s4 = inlined_call_operand.vmem [shape: bf16[256,512], index: 4, kind: input, shape index: {}]   ;;  %s4007_s5 = inlined_call_operand.vmem [shape: f32[1,512], index: 5, kind: input, shape index: {}]   ;;  %s4008_s6 = inlined_call_operand.vmem [shape: bf16[256,128], index: 6, kind: input, shape index: {}]   ;;  %s4009_s7 = inlined_call_operand.vmem [shape: f32[1,128], index: 7, kind: input, shape index: {}]   ;;  %s4010_s8 = inlined_call_operand.vmem [shape: bf16[128,256], index: 8, kind: input, shape index: {}]   ;;  %s4011_s9 = inlined_call_operand.vmem [shape: f32[1,256], index: 9, kind: input, shape index: {}]   ;;  %s4012_s10 = inlined_call_operand.hbm [shape: f32[8,256], index: 10, kind: output, shape index: {0}]   ;;  %s4013_s11 = inlined_call_operand.vmem [shape: f32[8,128], index: 11, kind: output, shape index: {1}, may-alias: {1,11}]  }
   0x1   :  { %v2891_v0 = vld [vmem:[%s4006_s4 + $0x4] ss:$16 sps:$4 sm:$0xff]   ;;  %v2893_v1 = vld [vmem:[%s4006_s4] ss:$16 sps:$4 sm:$0xff]   ;;  %v2909_v7 = vld [vmem:[%s4006_s4 + $0xc] ss:$16 sps:$4 sm:$0xff]  }
   0x2   :  { %452 = vmatprep.subr.bf16.mxu0 %v2891_v0  ;;  %v2894_v2 = vld [vmem:[%s4006_s4 + $0x24] ss:$16 sps:$4 sm:$0xff]   ;;  %v2896_v3 = vld [vmem:[%s4006_s4 + $0x20] ss:$16 sps:$4 sm:$0xff]   ;;  %v2911_v8 = vld [vmem:[%s4006_s4 + $0x8] ss:$16 sps:$4 sm:$0xff]   ;;  %493 = vmatprep.subr.bf16.mxu1 %v2909_v7 }
   0x3   :  { %453 = vmatpush1.bf16.msra.mxu0 %v2893_v1  ;;  %v2897_v4 = vld [vmem:[%s4006_s4 + $0x44] ss:$16 sps:$4 sm:$0xff]   ;;  %v2899_v5 = vld [vmem:[%s4006_s4 + $0x40] ss:$16 sps:$4 sm:$0xff]   ;;  %494 = vmatpush1.bf16.msra.mxu1 %v2911_v8  ;;  %v2915_v10 = vld [vmem:[%s4006_s4 + $0x2c] ss:$16 sps:$4 sm:$0xff]  }
   0x4   :  { %454 = vmatprep.subr.bf16.mxu0 %v2894_v2  ;;  %v2900_v6 = vld [vmem:[%s4006_s4 + $0x64] ss:$16 sps:$4 sm:$0xff]   ;;  %v2902_v9 = vld [vmem:[%s4006_s4 + $0x60] ss:$16 sps:$4 sm:$0xff]   ;;  %v2917_v11 = vld [vmem:[%s4006_s4 + $0x28] ss:$16 sps:$4 sm:$0xff]   ;;  %495 = vmatprep.subr.bf16.mxu1 %v2915_v10 }
   0x5   :  { %v2903_v12 = vld [vmem:[%s4006_s4 + $0x84] ss:$16 sps:$4 sm:$0xff]   ;;  %v2905_v13 = vld [vmem:[%s4006_s4 + $0x80] ss:$16 sps:$4 sm:$0xff]   ;;  %v2921_v14 = vld [vmem:[%s4006_s4 + $0x4c] ss:$16 sps:$4 sm:$0xff]  }
   0x6   :  { %v2906_v15 = vld [vmem:[%s4006_s4 + $0xa4] ss:$16 sps:$4 sm:$0xff]   ;;  %v2923_v16 = vld [vmem:[%s4006_s4 + $0x48] ss:$16 sps:$4 sm:$0xff]   ;;  %v2927_v17 = vld [vmem:[%s4006_s4 + $0x6c] ss:$16 sps:$4 sm:$0xff]  }
   0x7   :  { %455 = vmatpush1.bf16.msra.mxu0 %v2896_v3  ;;  %496 = vmatpush1.bf16.msra.mxu1 %v2917_v11  ;;  %v2908_v18 = vld [vmem:[%s4006_s4 + $0xa0] ss:$16 sps:$4 sm:$0xff]   ;;  %v2912_v19 = vld [vmem:[%s4006_s4 + $0xc4] ss:$16 sps:$4 sm:$0xff]   ;;  %v2929_v20 = vld [vmem:[%s4006_s4 + $0x68] ss:$16 sps:$4 sm:$0xff]  }
   0x8   :  { %456 = vmatprep.subr.bf16.mxu0 %v2897_v4  ;;  %497 = vmatprep.subr.bf16.mxu1 %v2921_v14  ;;  %v2933_v21 = vld [vmem:[%s4006_s4 + $0x8c] ss:$16 sps:$4 sm:$0xff]   ;;  %v2914_v22 = vld [vmem:[%s4006_s4 + $0xc0] ss:$16 sps:$4 sm:$0xff]   ;;  %v2918_v23 = vld [vmem:[%s4006_s4 + $0xe4] ss:$16 sps:$4 sm:$0xff]  }
   0x9   :  { %v2935_v24 = vld [vmem:[%s4006_s4 + $0x88] ss:$16 sps:$4 sm:$0xff]   ;;  %v2939_v25 = vld [vmem:[%s4006_s4 + $0xac] ss:$16 sps:$4 sm:$0xff]   ;;  %v2920_v26 = vld [vmem:[%s4006_s4 + $0xe0] ss:$16 sps:$4 sm:$0xff]  }
   0xa   :  { %v2924_v27 = vld [vmem:[%s4006_s4 + $0x104] ss:$16 sps:$4 sm:$0xff]   ;;  %v2941_v28 = vld [vmem:[%s4006_s4 + $0xa8] ss:$16 sps:$4 sm:$0xff]   ;;  %v2945_v29 = vld [vmem:[%s4006_s4 + $0xcc] ss:$16 sps:$4 sm:$0xff]  }
   0xb   :  { %457 = vmatpush1.bf16.msra.mxu0 %v2899_v5  ;;  %498 = vmatpush1.bf16.msra.mxu1 %v2923_v16  ;;  %v2926_v30 = vld [vmem:[%s4006_s4 + $0x100] ss:$16 sps:$4 sm:$0xff]   ;;  %v2930_v31 = vld [vmem:[%s4006_s4 + $0x124] ss:$16 sps:$4 sm:$0xff]   ;;  %v2947_v32 = vld [vmem:[%s4006_s4 + $0xc8] ss:$16 sps:$4 sm:$0xff]  }
   0xc   :  { %458 = vmatprep.subr.bf16.mxu0 %v2900_v6  ;;  %499 = vmatprep.subr.bf16.mxu1 %v2927_v17  ;;  %v2951_v33 = vld [vmem:[%s4006_s4 + $0xec] ss:$16 sps:$4 sm:$0xff]   ;;  %v2932_v34 = vld [vmem:[%s4006_s4 + $0x120] ss:$16 sps:$4 sm:$0xff]   ;;  %v2953_v35 = vld [vmem:[%s4006_s4 + $0xe8] ss:$16 sps:$4 sm:$0xff]  }
   0xd   :  { %v3348_v36 = vld [vmem:[%s4003_s1] sm:$0xff]  ;;  %v2957_v38 = vld [vmem:[%s4006_s4 + $0x10c] ss:$16 sps:$4 sm:$0xff]   ;;  %v2959_v41 = vld [vmem:[%s4006_s4 + $0x108] ss:$16 sps:$4 sm:$0xff]  }
   0xe   :  { %v2936_v37 = vld [vmem:[%s4006_s4 + $0x144] ss:$16 sps:$4 sm:$0xff]   ;;  %v45_v39 = vpack.c.bf16 %v3348_v36, %v3348_v36  ;;  %v2938_v40 = vld [vmem:[%s4006_s4 + $0x140] ss:$16 sps:$4 sm:$0xff]   ;;  %v2963_v43 = vld [vmem:[%s4006_s4 + $0x12c] ss:$16 sps:$4 sm:$0xff]  }
   0xf   :  { %459 = vmatpush1.bf16.msra.mxu0 %v2902_v9  ;;  %500 = vmatpush1.bf16.msra.mxu1 %v2929_v20  ;;  %v2942_v42 = vld [vmem:[%s4006_s4 + $0x164] ss:$16 sps:$4 sm:$0xff]   ;;  %v2944_v44 = vld [vmem:[%s4006_s4 + $0x160] ss:$16 sps:$4 sm:$0xff]   ;;  %v2965_v46 = vld [vmem:[%s4006_s4 + $0x128] ss:$16 sps:$4 sm:$0xff]  }
  0x10   :  { %460 = vmatprep.subr.bf16.mxu0 %v2903_v12  ;;  %501 = vmatprep.subr.bf16.mxu1 %v2933_v21  ;;  %v2948_v45 = vld [vmem:[%s4006_s4 + $0x184] ss:$16 sps:$4 sm:$0xff]   ;;  %v2969_v47 = vld [vmem:[%s4006_s4 + $0x14c] ss:$16 sps:$4 sm:$0xff]   ;;  %v2950_v48 = vld [vmem:[%s4006_s4 + $0x180] ss:$16 sps:$4 sm:$0xff]  }
  0x11   :  { %484 = vmatprep.mubr.bf16.mxu0 %v45_v39  ;;  %525 = vmatprep.mubr.bf16.mxu1 %v45_v39  ;;  %v2971_v49 = vld [vmem:[%s4006_s4 + $0x148] ss:$16 sps:$4 sm:$0xff]   ;;  %v2954_v50 = vld [vmem:[%s4006_s4 + $0x1a4] ss:$16 sps:$4 sm:$0xff]   ;;  %v2972_v51 = vld [vmem:[%s4006_s4 + $0x16c] ss:$16 sps:$4 sm:$0xff]  }
  0x12   :  { %v2956_v52 = vld [vmem:[%s4006_s4 + $0x1a0] ss:$16 sps:$4 sm:$0xff]   ;;  %v2974_v53 = vld [vmem:[%s4006_s4 + $0x168] ss:$16 sps:$4 sm:$0xff]   ;;  %v2960_v54 = vld [vmem:[%s4006_s4 + $0x1c4] ss:$16 sps:$4 sm:$0xff]  }
  0x13   :  { %461 = vmatpush1.bf16.msra.mxu0 %v2905_v13  ;;  %502 = vmatpush1.bf16.msra.mxu1 %v2935_v24  ;;  %v2975_v55 = vld [vmem:[%s4006_s4 + $0x18c] ss:$16 sps:$4 sm:$0xff]   ;;  %v2962_v56 = vld [vmem:[%s4006_s4 + $0x1c0] ss:$16 sps:$4 sm:$0xff]   ;;  %v2977_v57 = vld [vmem:[%s4006_s4 + $0x188] ss:$16 sps:$4 sm:$0xff]  }
  0x14   :  { %462 = vmatprep.subr.bf16.mxu0 %v2906_v15  ;;  %503 = vmatprep.subr.bf16.mxu1 %v2939_v25  ;;  %v2966_v58 = vld [vmem:[%s4006_s4 + $0x1e4] ss:$16 sps:$4 sm:$0xff]   ;;  %v2978_v59 = vld [vmem:[%s4006_s4 + $0x1ac] ss:$16 sps:$4 sm:$0xff]   ;;  %v2968_v60 = vld [vmem:[%s4006_s4 + $0x1e0] ss:$16 sps:$4 sm:$0xff]  }
  0x15   :  { %v2980_v61 = vld [vmem:[%s4006_s4 + $0x1a8] ss:$16 sps:$4 sm:$0xff]   ;;  %v2981_v62 = vld [vmem:[%s4006_s4 + $0x1cc] ss:$16 sps:$4 sm:$0xff]   ;;  %v43_v63 = vld [vmem:[%s4002_s0] sm:$0xf] }
  0x16   :  { %v2983_v0 = vld [vmem:[%s4006_s4 + $0x1c8] ss:$16 sps:$4 sm:$0xff]   ;;  %v2984_v1 = vld [vmem:[%s4006_s4 + $0x1ec] ss:$16 sps:$4 sm:$0xff]  }
  0x17   :  { %463 = vmatpush1.bf16.msra.mxu0 %v2908_v18  ;;  %504 = vmatpush1.bf16.msra.mxu1 %v2941_v28  ;;  %v2986_v2 = vld [vmem:[%s4006_s4 + $0x1e8] ss:$16 sps:$4 sm:$0xff]  }
  0x18   :  { %464 = vmatprep.subr.bf16.mxu0 %v2912_v19  ;;  %505 = vmatprep.subr.bf16.mxu1 %v2945_v29 }
  0x1b   :  { %465 = vmatpush1.bf16.msra.mxu0 %v2914_v22  ;;  %506 = vmatpush1.bf16.msra.mxu1 %v2947_v32 }
  0x1c   :  { %466 = vmatprep.subr.bf16.mxu0 %v2918_v23  ;;  %507 = vmatprep.subr.bf16.mxu1 %v2951_v33 }
  0x1f   :  { %467 = vmatpush1.bf16.msra.mxu0 %v2920_v26  ;;  %508 = vmatpush1.bf16.msra.mxu1 %v2953_v35 }
  0x20   :  { %468 = vmatprep.subr.bf16.mxu0 %v2924_v27  ;;  %509 = vmatprep.subr.bf16.mxu1 %v2957_v38 }
  0x23   :  { %469 = vmatpush1.bf16.msra.mxu0 %v2926_v30  ;;  %510 = vmatpush1.bf16.msra.mxu1 %v2959_v41 }
  0x24   :  { %470 = vmatprep.subr.bf16.mxu0 %v2930_v31  ;;  %511 = vmatprep.subr.bf16.mxu1 %v2963_v43 }
  0x27   :  { %471 = vmatpush1.bf16.msra.mxu0 %v2932_v34  ;;  %512 = vmatpush1.bf16.msra.mxu1 %v2965_v46 }
  0x28   :  { %472 = vmatprep.subr.bf16.mxu0 %v2936_v37  ;;  %513 = vmatprep.subr.bf16.mxu1 %v2969_v47 }
  0x2b   :  { %473 = vmatpush1.bf16.msra.mxu0 %v2938_v40  ;;  %514 = vmatpush1.bf16.msra.mxu1 %v2971_v49 }
  0x2c   :  { %474 = vmatprep.subr.bf16.mxu0 %v2942_v42  ;;  %515 = vmatprep.subr.bf16.mxu1 %v2972_v51 }
  0x2f   :  { %475 = vmatpush1.bf16.msra.mxu0 %v2944_v44  ;;  %516 = vmatpush1.bf16.msra.mxu1 %v2974_v53 }
  0x30   :  { %476 = vmatprep.subr.bf16.mxu0 %v2948_v45  ;;  %517 = vmatprep.subr.bf16.mxu1 %v2975_v55 }
  0x33   :  { %477 = vmatpush1.bf16.msra.mxu0 %v2950_v48  ;;  %518 = vmatpush1.bf16.msra.mxu1 %v2977_v57 }
  0x34   :  { %478 = vmatprep.subr.bf16.mxu0 %v2954_v50  ;;  %519 = vmatprep.subr.bf16.mxu1 %v2978_v59 }
  0x37   :  { %479 = vmatpush1.bf16.msra.mxu0 %v2956_v52  ;;  %520 = vmatpush1.bf16.msra.mxu1 %v2980_v61 }
  0x38   :  { %480 = vmatprep.subr.bf16.mxu0 %v2960_v54  ;;  %521 = vmatprep.subr.bf16.mxu1 %v2981_v62 }
  0x3b   :  { %481 = vmatpush1.bf16.msra.mxu0 %v2962_v56  ;;  %522 = vmatpush1.bf16.msra.mxu1 %v2983_v0 }
  0x3c   :  { %482 = vmatprep.subr.bf16.mxu0 %v2966_v58  ;;  %523 = vmatprep.subr.bf16.mxu1 %v2984_v1 }
  0x3f   :  { %483 = vmatpush1.bf16.msra.mxu0 %v2968_v60  ;;  %524 = vmatpush1.bf16.msra.mxu1 %v2986_v2 }
  0x42   :  { %485 = vmatmul.mubr.bf16.vlgmr.msra.gmra.mrb[0].mxu0 %v43_v63  ;;  %526 = vmatmul.mubr.bf16.vlgmr.msra.gmra.mrb[0].mxu1 %v43_v63 }
  0x43   :  { %17 = vsyncpa [#allocation6], 0  ;;  %v2987_v3 = vld [vmem:[%s4004_s2] sm:$0xff]   ;;  %v3171_v4 = vmov 0.0   ;;  %v2989_v6 = vld [vmem:[%s4004_s2 + $0x8] sm:$0xff]   ;;  %vm3172_vm0 = vmmov 0   ;;  %v112_v20 = vlaneseq }
  0x44   :  { %2675 = vmatprep.subr.bf16.mxu0 %v3171_v4  ;;  %2695 = vmatprep.subr.bf16.mxu1 %v3171_v4  ;;  %v2988_v5 = vld [vmem:[%s4004_s2 + $0x40] sm:$0xff]   ;;  %v2990_v7 = vld [vmem:[%s4004_s2 + $0x48] sm:$0xff]   ;;  %v2991_v8 = vld [vmem:[%s4004_s2 + $0x10] sm:$0xff]   ;;  %v3173_v53 = vmov 1966171168   ;;  %vm1468_vm1 = vcmask 57344  }
  0x45   :  { %2676 = vmatpush3.bf16.msra.mxu0 %v2987_v3  ;;  %2696 = vmatpush3.bf16.msra.mxu1 %v2988_v5  ;;  %v2992_v9 = vld [vmem:[%s4004_s2 + $0x50] sm:$0xff]   ;;  %v2993_v10 = vld [vmem:[%s4004_s2 + $0x18] sm:$0xff]   ;;  %v2995_v12 = vld [vmem:[%s4004_s2 + $0x20] sm:$0xff]   ;;  %v3509_v21 = vshrl.u32 %v112_v20, 7  ;;  %v557_v54 = vunpack.c.l.s4 %v3173_v53  ;;  %vm1577_vm2 = vcmask 1043456   ;;  %vm1573_vm3 = vcmask 64512  }
  0x46   :  { %2677 = vmatprep.subr.bf16.mxu0 %v3171_v4  ;;  %2697 = vmatprep.subr.bf16.mxu1 %v3171_v4  ;;  %v2994_v11 = vld [vmem:[%s4004_s2 + $0x58] sm:$0xff]   ;;  %v2996_v13 = vld [vmem:[%s4004_s2 + $0x60] sm:$0xff]   ;;  %v2997_v14 = vld [vmem:[%s4004_s2 + $0x28] sm:$0xff]   ;;  %vm1952_vm4 = vcmask 1041409   ;;  %vm1955_vm5 = vcmask 1042434   ;;  %vm1958_vm6 = vcmask 1043459  }
  0x47   :  { %v2998_v15 = vld [vmem:[%s4004_s2 + $0x68] sm:$0xff]   ;;  %v2999_v16 = vld [vmem:[%s4004_s2 + $0x30] sm:$0xff]   ;;  %2691 = vmatprep.mubr.msk.bf16.mxu0 %vm3172_vm0, %v3171_v4  ;;  %v3001_v18 = vld [vmem:[%s4004_s2 + $0x38] sm:$0xff]   ;;  %2711 = vmatprep.mubr.msk.bf16.mxu1 %vm3172_vm0, %v3171_v4  ;;  %v3512_v22 = vsub.s32 0, %v3509_v21  ;;  %v118_v24 = vsub.s32 1, %v3509_v21  ;;  %v126_v42 = vsub.s32 3, %v3509_v21  ;;  %v558_v57 = vunpack.c.0.s8 %v557_v54 }
  0x48   :  { %v3000_v17 = vld [vmem:[%s4004_s2 + $0x70] sm:$0xff]   ;;  %v3002_v19 = vld [vmem:[%s4004_s2 + $0x78] sm:$0xff]   ;;  %v110_v23 = vld [vmem:[%s4007_s5] sm:$0xf]  ;;  %v122_v43 = vsub.s32 2, %v3509_v21  ;;  %vm1961_vm7 = vcmask 1044484  }
  0x49   :  { %2678 = vmatpush3.bf16.msra.mxu0 %v2989_v6  ;;  %2698 = vmatpush3.bf16.msra.mxu1 %v2990_v7  ;;  %v115_v25 = vrot.slane %v110_v23, %v3512_v22  ;;  %v119_v27 = vrot.slane %v110_v23, %v118_v24  ;;  %v127_v44 = vrot.slane %v110_v23, %v126_v42  ;;  %v3004_v7 = vld [vmem:[%s4004_s2 + $0xc0] sm:$0xff]   ;;  %vm1964_vm8 = vcmask 1045509  }
  0x4a   :  { %2679 = vmatprep.subr.bf16.mxu0 %v3171_v4  ;;  %2699 = vmatprep.subr.bf16.mxu1 %v3171_v4  ;;  %v123_v47 = vrot.slane %v110_v23, %v122_v43  ;;  %v561_v62 = vsub.s32 %v558_v57, %v3509_v21  ;;  %v3015_v23 = vld [vmem:[%s4004_s2 + $0xb0] sm:$0xff]   ;;  %v3027_v42 = vld [vmem:[%s4004_s2 + $0x120] sm:$0xff]   ;;  %vm1967_vm9 = vcmask 1046534   ;;  %vm1970_vm10 = vcmask 1047559  }
  0x4b   :  { %v3028_v43 = vld [vmem:[%s4004_s2 + $0x160] sm:$0xff]   ;;  %vm2151_vm11 = vcmask 7168  }
  0x4c   :  { %v3035_v54 = vld [vmem:[%s4004_s2 + $0x180] sm:$0xff]   ;;  %2153 = vst.msk [vmem:[#allocation4] sm:$0xff] %vm2151_vm11, %v3171_v4 }
  0x4d   :  { %2680 = vmatpush3.bf16.msra.mxu0 %v2991_v8  ;;  %2700 = vmatpush3.bf16.msra.mxu1 %v2992_v9  ;;  %v3005_v9 = vld [vmem:[%s4004_s2 + $0x88] sm:$0xff]  }
  0x4e   :  { %2681 = vmatprep.subr.bf16.mxu0 %v3171_v4  ;;  %2701 = vmatprep.subr.bf16.mxu1 %v3171_v4 }
  0x51   :  { %2682 = vmatpush3.bf16.msra.mxu0 %v2993_v10  ;;  %2702 = vmatpush3.bf16.msra.mxu1 %v2994_v11  ;;  %v3006_v10 = vld [vmem:[%s4004_s2 + $0xc8] sm:$0xff]   ;;  %v3007_v11 = vld [vmem:[%s4004_s2 + $0x90] sm:$0xff]  }
  0x52   :  { %2683 = vmatprep.subr.bf16.mxu0 %v3171_v4  ;;  %2703 = vmatprep.subr.bf16.mxu1 %v3171_v4 }
  0x55   :  { %2684 = vmatpush3.bf16.msra.mxu0 %v2995_v12  ;;  %2704 = vmatpush3.bf16.msra.mxu1 %v2996_v13  ;;  %v3008_v12 = vld [vmem:[%s4004_s2 + $0xd0] sm:$0xff]   ;;  %v3009_v13 = vld [vmem:[%s4004_s2 + $0x98] sm:$0xff]  }
  0x56   :  { %2685 = vmatprep.subr.bf16.mxu0 %v3171_v4  ;;  %2705 = vmatprep.subr.bf16.mxu1 %v3171_v4 }
  0x59   :  { %2686 = vmatpush3.bf16.msra.mxu0 %v2997_v14  ;;  %2706 = vmatpush3.bf16.msra.mxu1 %v2998_v15  ;;  %v3010_v14 = vld [vmem:[%s4004_s2 + $0xd8] sm:$0xff]   ;;  %v3011_v15 = vld [vmem:[%s4004_s2 + $0xa0] sm:$0xff]  }
  0x5a   :  { %2687 = vmatprep.subr.bf16.mxu0 %v3171_v4  ;;  %2707 = vmatprep.subr.bf16.mxu1 %v3171_v4 }
  0x5d   :  { %2688 = vmatpush3.bf16.msra.mxu0 %v2999_v16  ;;  %2708 = vmatpush3.bf16.msra.mxu1 %v3000_v17  ;;  %v3012_v16 = vld [vmem:[%s4004_s2 + $0xe0] sm:$0xff]  }
  0x5e   :  { %2689 = vmatprep.subr.bf16.mxu0 %v3171_v4  ;;  %2709 = vmatprep.subr.bf16.mxu1 %v3171_v4 }
  0x61   :  { %2690 = vmatpush3.bf16.msra.mxu0 %v3001_v18  ;;  %2710 = vmatpush3.bf16.msra.mxu1 %v3002_v19  ;;  %v3013_v18 = vld [vmem:[%s4004_s2 + $0xa8] sm:$0xff]  }
  0x62   :  { %2715 = vmatprep.subr.bf16.mxu0 %v3171_v4  ;;  %2735 = vmatprep.subr.bf16.mxu1 %v3171_v4  ;;  %v3014_v19 = vld [vmem:[%s4004_s2 + $0xe8] sm:$0xff]  }
 0x115   :  { %v486_v26 = vpop.f32.mrb[0].mxu0  ;;  %v527_v35 = vpop.f32.mrb[0].mxu1 }
 0x116   :  { %v487_v28 = vadd.f32 %v486_v26, %v115_v25  ;;  %v488_v29 = vpop.f32.mrb[1].mxu0  ;;  %v529_v37 = vpop.f32.mrb[1].mxu1  ;;  %v528_v50 = vadd.f32 %v527_v35, %v123_v47  ;;  %v3016_v25 = vld [vmem:[%s4004_s2 + $0xf0] sm:$0xff]   ;;  %v3021_v35 = vld [vmem:[%s4004_s2 + $0x108] sm:$0xff]  }
 0x117   :  { %v490_v30 = vpop.f32.mrb[2].mxu0  ;;  %v489_v33 = vadd.f32 %v488_v29, %v119_v27  ;;  %v531_v38 = vpop.f32.mrb[2].mxu1  ;;  %v530_v48 = vadd.f32 %v529_v37, %v127_v44  ;;  %v3017_v27 = vld [vmem:[%s4004_s2 + $0xb8] sm:$0xff]   ;;  %v3022_v37 = vld [vmem:[%s4004_s2 + $0x148] sm:$0xff]   ;;  %v3031_v47 = vld [vmem:[%s4004_s2 + $0x130] sm:$0xff]  }
 0x118   :  { %v2454_v31 = vmul.f32 -1.442695, %v487_v28  ;;  %v491_v32 = vpop.f32.mrb[3].mxu0  ;;  %v532_v39 = vpop.f32.mrb[3].mxu1  ;;  %v3018_v29 = vld [vmem:[%s4004_s2 + $0xf8] sm:$0xff]   ;;  %v3023_v38 = vld [vmem:[%s4004_s2 + $0x110] sm:$0xff]  }
 0x119   :  { %v2455_v34 = vmul.f32 -1.442695, %v489_v33  ;;  %v3020_v33 = vld [vmem:[%s4004_s2 + $0x140] sm:$0xff]   ;;  %v3024_v39 = vld [vmem:[%s4004_s2 + $0x150] sm:$0xff]   ;;  %v3029_v44 = vld [vmem:[%s4004_s2 + $0x128] sm:$0xff]  }
 0x11a   :  { %3091 = vpow2.f32 %v2454_v31  ;;  %v3019_v31 = vld [vmem:[%s4004_s2 + $0x100] sm:$0xff]  }
 0x11b   :  { %3093 = vpow2.f32 %v2455_v34 }
 0x124   :  { %v3092_v40 = vpop.eup %3091 }
 0x125   :  { %v537_v41 = vadd.f32 1.0, %v3092_v40  ;;  %v3094_v45 = vpop.eup %3093  ;;  %v3025_v40 = vld [vmem:[%s4004_s2 + $0x118] sm:$0xff]  }
 0x126   :  { %v543_v46 = vadd.f32 1.0, %v3094_v45  ;;  %v3030_v45 = vld [vmem:[%s4004_s2 + $0x168] sm:$0xff]  }
 0x127   :  { %3095 = vrcp.f32 %v537_v41  ;;  %v3026_v41 = vld [vmem:[%s4004_s2 + $0x158] sm:$0xff]  }
 0x128   :  { %3097 = vrcp.f32 %v543_v46 }
 0x131   :  { %v3096_v49 = vpop.eup %3095 }
 0x132   :  { %v546_v51 = vmul.f32 %v3096_v49, %v530_v48  ;;  %v3098_v55 = vpop.eup %3097  ;;  %v3032_v48 = vld [vmem:[%s4004_s2 + $0x170] sm:$0xff]  }
 0x133   :  { %v549_v56 = vsub.f32 1.0, %v3098_v55  ;;  %v551_v59 = vmul.f32 %v3098_v55, %v3348_v36  ;;  %v3003_v36 = vld [vmem:[%s4004_s2 + $0x80] sm:$0xff]  }
 0x134   :  { %v547_v52 = vadd.f32 %v546_v51, %v528_v50  ;;  %v3033_v50 = vld [vmem:[%s4004_s2 + $0x138] sm:$0xff]  }
 0x136   :  { %3099 = vtanh.f32 %v547_v52  ;;  %v3034_v52 = vld [vmem:[%s4004_s2 + $0x178] sm:$0xff]  }
 0x140   :  { %v3100_v58 = vpop.eup %3099 }
 0x141   :  { %v550_v60 = vmul.f32 %v3100_v58, %v549_v56  ;;  %v3036_v56 = vld [vmem:[%s4004_s2 + $0x1c0] sm:$0xff]   ;;  %v3037_v58 = vld [vmem:[%s4004_s2 + $0x188] sm:$0xff]  }
 0x143   :  { %v552_v61 = vadd.f32 %v551_v59, %v550_v60  ;;  %v3038_v59 = vld [vmem:[%s4004_s2 + $0x1c8] sm:$0xff]   ;;  %v3039_v60 = vld [vmem:[%s4004_s2 + $0x190] sm:$0xff]  }
 0x145   :  { %553 = vst [vmem:[%s4013_s11] sm:$0xff] %v552_v61  ;;  %v3528_v63 = vpack.c.bf16 %v552_v61, %v552_v61  ;;  %v3040_v61 = vld [vmem:[%s4004_s2 + $0x1d0] sm:$0xff]  }
 0x147   :  { %v562_v0 = vrot.slane %v3528_v63, %v561_v62 }
 0x149   :  { %v3531_v1 = vrot.slane %v562_v0, %v561_v62  ;;  %v563_v17 = vcombine.high %v562_v0, %v562_v0  ;;  %v3042_v0 = vld [vmem:[%s4004_s2 + $0x1d8] sm:$0xff]  }
 0x14b   :  { %v2456_v2 = vpack.i.b16 %v3531_v1, %v3531_v1  ;;  %v581_v3 = vunpack.i.h.s16 %v3531_v1  ;;  %v3588_v20 = vrot.slane %v563_v17, %v561_v62  ;;  %v578_v46 = vcombine.high %v3531_v1, %v3531_v1  ;;  %v3041_v62 = vld [vmem:[%s4004_s2 + $0x198] sm:$0xff]   ;;  %v3043_v1 = vld [vmem:[%s4004_s2 + $0x1a0] sm:$0xff]  }
 0x14d   :  { %v720_v5 = vrot.slane %v2456_v2, %v3512_v22  ;;  %v810_v6 = vpack.i.b16 %v581_v3, %v581_v3  ;;  %v583_v26 = vunpack.i.h.s16 %v3588_v20  ;;  %v2473_v28 = vpack.i.b16 %v3588_v20, %v3588_v20  ;;  %v3044_v2 = vld [vmem:[%s4004_s2 + $0x1e0] sm:$0xff]   ;;  %v3045_v3 = vld [vmem:[%s4004_s2 + $0x1a8] sm:$0xff]  }
 0x14e   :  { %v585_v49 = vunpack.i.h.s16 %v578_v46  ;;  %v2490_v51 = vpack.i.b16 %v578_v46, %v578_v46 }
 0x14f   :  { %2692 = vmatmul.mubr.bf16.vlgmr.msra.gmra.mrb[4].mxu0 %v720_v5  ;;  %v814_v8 = vrot.slane %v810_v6, %v3512_v22  ;;  %v998_v30 = vpack.i.b16 %v583_v26, %v583_v26  ;;  %v908_v32 = vrot.slane %v2473_v28, %v3512_v22  ;;  %v579_v5 = vcombine.high %v3588_v20, %v3588_v20  ;;  %v3047_v6 = vld [vmem:[%s4004_s2 + $0x1b0] sm:$0xff]  }
 0x150   :  { %2716 = vmatpush3.bf16.msra.mxu0 %v3003_v36  ;;  %2731 = vmatprep.mubr.msk.bf16.mxu0 %vm3172_vm0, %v3171_v4  ;;  %v1186_v53 = vpack.i.b16 %v585_v49, %v585_v49  ;;  %v1096_v55 = vrot.slane %v2490_v51, %v3512_v22  ;;  %v3046_v36 = vld [vmem:[%s4004_s2 + $0x1e8] sm:$0xff]  }
 0x151   :  { %2712 = vmatmul.mubr.bf16.vlgmr.msra.gmra.mrb[4].mxu1 %v814_v8  ;;  %2717 = vmatprep.subr.bf16.mxu0 %v3171_v4  ;;  %v1002_v34 = vrot.slane %v998_v30, %v3512_v22  ;;  %v587_v8 = vunpack.i.h.s16 %v579_v5 }
 0x152   :  { %2736 = vmatpush3.bf16.msra.mxu1 %v3004_v7  ;;  %2751 = vmatprep.mubr.msk.bf16.mxu1 %vm3172_vm0, %v3171_v4  ;;  %v1190_v57 = vrot.slane %v1186_v53, %v3512_v22  ;;  %v3048_v7 = vld [vmem:[%s4004_s2 + $0x1f0] sm:$0xff]  }
 0x153   :  { %2737 = vmatprep.subr.bf16.mxu1 %v3171_v4 }
 0x154   :  { %2718 = vmatpush3.bf16.msra.mxu0 %v3005_v9  ;;  %v3049_v9 = vld [vmem:[%s4004_s2 + $0x1b8] sm:$0xff]  }
 0x155   :  { %2719 = vmatprep.subr.bf16.mxu0 %v3171_v4 }
 0x156   :  { %2738 = vmatpush3.bf16.msra.mxu1 %v3006_v10  ;;  %v2507_v10 = vpack.i.b16 %v579_v5, %v579_v5 }
 0x157   :  { %2739 = vmatprep.subr.bf16.mxu1 %v3171_v4 }
 0x158   :  { %2720 = vmatpush3.bf16.msra.mxu0 %v3007_v11  ;;  %v3050_v11 = vld [vmem:[%s4004_s2 + $0x1f8] sm:$0xff]  }
 0x159   :  { %2721 = vmatprep.subr.bf16.mxu0 %v3171_v4 }
 0x15a   :  { %2740 = vmatpush3.bf16.msra.mxu1 %v3008_v12  ;;  %v1374_v12 = vpack.i.b16 %v587_v8, %v587_v8 }
 0x15b   :  { %2741 = vmatprep.subr.bf16.mxu1 %v3171_v4 }
 0x15c   :  { %2722 = vmatpush3.bf16.msra.mxu0 %v3009_v13  ;;  %v1284_v13 = vrot.slane %v2507_v10, %v3512_v22 }
 0x15d   :  { %2723 = vmatprep.subr.bf16.mxu0 %v3171_v4 }
 0x15e   :  { %2742 = vmatpush3.bf16.msra.mxu1 %v3010_v14  ;;  %v1378_v14 = vrot.slane %v1374_v12, %v3512_v22  ;;  %v1565_v12 = vld [vmem:[%s4005_s3] sm:$0xf] }
 0x15f   :  { %2743 = vmatprep.subr.bf16.mxu1 %v3171_v4 }
 0x160   :  { %2724 = vmatpush3.bf16.msra.mxu0 %v3011_v15 }
 0x161   :  { %2725 = vmatprep.subr.bf16.mxu0 %v3171_v4 }
 0x162   :  { %2744 = vmatpush3.bf16.msra.mxu1 %v3012_v16 }
 0x163   :  { %2745 = vmatprep.subr.bf16.mxu1 %v3171_v4 }
 0x164   :  { %2726 = vmatpush3.bf16.msra.mxu0 %v3013_v18 }
 0x165   :  { %2727 = vmatprep.subr.bf16.mxu0 %v3171_v4 }
 0x166   :  { %2746 = vmatpush3.bf16.msra.mxu1 %v3014_v19 }
 0x167   :  { %2747 = vmatprep.subr.bf16.mxu1 %v3171_v4 }
 0x168   :  { %2728 = vmatpush3.bf16.msra.mxu0 %v3015_v23 }
 0x169   :  { %2729 = vmatprep.subr.bf16.mxu0 %v3171_v4 }
 0x16a   :  { %2748 = vmatpush3.bf16.msra.mxu1 %v3016_v25 }
 0x16b   :  { %2749 = vmatprep.subr.bf16.mxu1 %v3171_v4 }
 0x16c   :  { %2730 = vmatpush3.bf16.msra.mxu0 %v3017_v27 }
 0x16d   :  { %2755 = vmatprep.subr.bf16.mxu0 %v3171_v4 }
 0x16e   :  { %2750 = vmatpush3.bf16.msra.mxu1 %v3018_v29 }
 0x16f   :  { %2732 = vmatmul.mubr.bf16.vlgmr.msra.gmra.mrb[8].mxu0 %v908_v32  ;;  %2775 = vmatprep.subr.bf16.mxu1 %v3171_v4 }
 0x170   :  { %2756 = vmatpush3.bf16.msra.mxu0 %v3019_v31  ;;  %2771 = vmatprep.mubr.msk.bf16.mxu0 %vm3172_vm0, %v3171_v4 }
 0x171   :  { %2752 = vmatmul.mubr.bf16.vlgmr.msra.gmra.mrb[8].mxu1 %v1002_v34  ;;  %2757 = vmatprep.subr.bf16.mxu0 %v3171_v4 }
 0x172   :  { %2776 = vmatpush3.bf16.msra.mxu1 %v3020_v33  ;;  %2791 = vmatprep.mubr.msk.bf16.mxu1 %vm3172_vm0, %v3171_v4 }
 0x173   :  { %2777 = vmatprep.subr.bf16.mxu1 %v3171_v4 }
 0x174   :  { %2758 = vmatpush3.bf16.msra.mxu0 %v3021_v35 }
 0x175   :  { %2759 = vmatprep.subr.bf16.mxu0 %v3171_v4 }
 0x176   :  { %2778 = vmatpush3.bf16.msra.mxu1 %v3022_v37 }
 0x177   :  { %2779 = vmatprep.subr.bf16.mxu1 %v3171_v4 }
 0x178   :  { %2760 = vmatpush3.bf16.msra.mxu0 %v3023_v38 }
 0x179   :  { %2761 = vmatprep.subr.bf16.mxu0 %v3171_v4 }
 0x17a   :  { %2780 = vmatpush3.bf16.msra.mxu1 %v3024_v39 }
 0x17b   :  { %2781 = vmatprep.subr.bf16.mxu1 %v3171_v4 }
 0x17c   :  { %2762 = vmatpush3.bf16.msra.mxu0 %v3025_v40 }
 0x17d   :  { %2763 = vmatprep.subr.bf16.mxu0 %v3171_v4 }
 0x17e   :  { %2782 = vmatpush3.bf16.msra.mxu1 %v3026_v41 }
 0x17f   :  { %2783 = vmatprep.subr.bf16.mxu1 %v3171_v4 }
 0x180   :  { %2764 = vmatpush3.bf16.msra.mxu0 %v3027_v42 }
 0x181   :  { %2765 = vmatprep.subr.bf16.mxu0 %v3171_v4 }
 0x182   :  { %2784 = vmatpush3.bf16.msra.mxu1 %v3028_v43 }
 0x183   :  { %2785 = vmatprep.subr.bf16.mxu1 %v3171_v4 }
 0x184   :  { %2766 = vmatpush3.bf16.msra.mxu0 %v3029_v44 }
 0x185   :  { %2767 = vmatprep.subr.bf16.mxu0 %v3171_v4 }
 0x186   :  { %2786 = vmatpush3.bf16.msra.mxu1 %v3030_v45 }
 0x187   :  { %2787 = vmatprep.subr.bf16.mxu1 %v3171_v4 }
 0x188   :  { %2768 = vmatpush3.bf16.msra.mxu0 %v3031_v47 }
 0x189   :  { %2769 = vmatprep.subr.bf16.mxu0 %v3171_v4 }
 0x18a   :  { %2788 = vmatpush3.bf16.msra.mxu1 %v3032_v48 }
 0x18b   :  { %2789 = vmatprep.subr.bf16.mxu1 %v3171_v4 }
 0x18c   :  { %2770 = vmatpush3.bf16.msra.mxu0 %v3033_v50 }
 0x18d   :  { %2795 = vmatprep.subr.bf16.mxu0 %v3171_v4 }
 0x18e   :  { %2790 = vmatpush3.bf16.msra.mxu1 %v3034_v52 }
 0x18f   :  { %2772 = vmatmul.mubr.bf16.vlgmr.msra.gmra.mrb[12].mxu0 %v1096_v55  ;;  %2815 = vmatprep.subr.bf16.mxu1 %v3171_v4 }
 0x190   :  { %2796 = vmatpush3.bf16.msra.mxu0 %v3035_v54  ;;  %2811 = vmatprep.mubr.msk.bf16.mxu0 %vm3172_vm0, %v3171_v4 }
 0x191   :  { %2792 = vmatmul.mubr.bf16.vlgmr.msra.gmra.mrb[12].mxu1 %v1190_v57  ;;  %2797 = vmatprep.subr.bf16.mxu0 %v3171_v4 }
 0x192   :  { %2816 = vmatpush3.bf16.msra.mxu1 %v3036_v56  ;;  %2831 = vmatprep.mubr.msk.bf16.mxu1 %vm3172_vm0, %v3171_v4 }
 0x193   :  { %2817 = vmatprep.subr.bf16.mxu1 %v3171_v4 }
 0x194   :  { %2798 = vmatpush3.bf16.msra.mxu0 %v3037_v58 }
 0x195   :  { %2799 = vmatprep.subr.bf16.mxu0 %v3171_v4 }
 0x196   :  { %2818 = vmatpush3.bf16.msra.mxu1 %v3038_v59 }
 0x197   :  { %2819 = vmatprep.subr.bf16.mxu1 %v3171_v4 }
 0x198   :  { %2800 = vmatpush3.bf16.msra.mxu0 %v3039_v60 }
 0x199   :  { %2801 = vmatprep.subr.bf16.mxu0 %v3171_v4 }
 0x19a   :  { %2820 = vmatpush3.bf16.msra.mxu1 %v3040_v61 }
 0x19b   :  { %2821 = vmatprep.subr.bf16.mxu1 %v3171_v4 }
 0x19c   :  { %2802 = vmatpush3.bf16.msra.mxu0 %v3041_v62 }
 0x19d   :  { %2803 = vmatprep.subr.bf16.mxu0 %v3171_v4 }
 0x19e   :  { %2822 = vmatpush3.bf16.msra.mxu1 %v3042_v0 }
 0x19f   :  { %2823 = vmatprep.subr.bf16.mxu1 %v3171_v4 }
 0x1a0   :  { %2804 = vmatpush3.bf16.msra.mxu0 %v3043_v1 }
 0x1a1   :  { %2805 = vmatprep.subr.bf16.mxu0 %v3171_v4 }
 0x1a2   :  { %2824 = vmatpush3.bf16.msra.mxu1 %v3044_v2 }
 0x1a3   :  { %2825 = vmatprep.subr.bf16.mxu1 %v3171_v4 }
 0x1a4   :  { %2806 = vmatpush3.bf16.msra.mxu0 %v3045_v3 }
 0x1a5   :  { %2807 = vmatprep.subr.bf16.mxu0 %v3171_v4 }
 0x1a6   :  { %2826 = vmatpush3.bf16.msra.mxu1 %v3046_v36 }
 0x1a7   :  { %2827 = vmatprep.subr.bf16.mxu1 %v3171_v4 }
 0x1a8   :  { %2808 = vmatpush3.bf16.msra.mxu0 %v3047_v6 }
 0x1a9   :  { %2809 = vmatprep.subr.bf16.mxu0 %v3171_v4 }
 0x1aa   :  { %2828 = vmatpush3.bf16.msra.mxu1 %v3048_v7 }
 0x1ab   :  { %2829 = vmatprep.subr.bf16.mxu1 %v3171_v4 }
 0x1ac   :  { %2810 = vmatpush3.bf16.msra.mxu0 %v3049_v9 }
 0x1ad   :  { %2835 = vmatprep.subr.bf16.mxu0 %v3171_v4 }
 0x1ae   :  { %2830 = vmatpush3.bf16.msra.mxu1 %v3050_v11 }
 0x1af   :  { %2812 = vmatmul.mubr.bf16.vlgmr.msra.gmra.mrb[16].mxu0 %v1284_v13  ;;  %2841 = vmatprep.subr.bf16.mxu1 %v3171_v4  ;;  %v1579_v13 = vsel %vm1577_vm2, %v1565_v12, 0 }
 0x1b0   :  { %2837 = vmatprep.mubr.msk.bf16.mxu0 %vm3172_vm0, %v3171_v4  ;;  %2836 = vmatpush3.bf16.msra.mxu0 %v1579_v13 }
 0x1b1   :  { %2832 = vmatmul.mubr.bf16.vlgmr.msra.gmra.mrb[16].mxu1 %v1378_v14  ;;  %2847 = vmatprep.subr.bf16.mxu0 %v3171_v4  ;;  %v1566_v14 = vld [vmem:[%s4005_s3 + $0x4] sm:$0xf] }
 0x1b2   :  { %2843 = vmatprep.mubr.msk.bf16.mxu1 %vm3172_vm0, %v3171_v4 }
 0x222   :  { %v804_v15 = vpop.f32.mrb[4].mxu0 }
 0x223   :  { %v2693_v16 = vpop.f32.mrb[5].mxu0  ;;  %v1469_v17 = vsel %vm1468_vm1, %v804_v15, -inf }
 0x224   :  { %1470 = vmax.xlane.f32.xlu0 %v1469_v17  ;;  %v807_v18 = vpop.f32.mrb[6].mxu0  ;;  %v898_v19 = vpop.f32.mrb[4].mxu1  ;;  %v1625_v16 = vsel %vm1577_vm2, %v1566_v14, 0 }
 0x225   :  { %v2694_v20 = vpop.f32.mrb[7].mxu0  ;;  %v2713_v23 = vpop.f32.mrb[5].mxu1  ;;  %v1472_v27 = vsel %vm1468_vm1, %v898_v19, -inf  ;;  %2842 = vmatpush3.bf16.msra.mxu1 %v1625_v16 }
 0x226   :  { %v901_v25 = vpop.f32.mrb[6].mxu1  ;;  %2853 = vmatprep.subr.bf16.mxu1 %v3171_v4 }
 0x227   :  { %v2714_v26 = vpop.f32.mrb[7].mxu1 }
 0x228   :  { %1473 = vmax.xlane.f32.xlu0 %v1472_v27 }
 0x242   :  { %v992_v28 = vpop.f32.mrb[8].mxu0 }
 0x243   :  { %v2733_v29 = vpop.f32.mrb[9].mxu0  ;;  %v1475_v30 = vsel %vm1468_vm1, %v992_v28, -inf }
 0x244   :  { %1476 = vmax.xlane.f32.xlu1 %v1475_v30  ;;  %v995_v31 = vpop.f32.mrb[10].mxu0  ;;  %v1086_v32 = vpop.f32.mrb[8].mxu1 }
 0x245   :  { %v2734_v33 = vpop.f32.mrb[11].mxu0  ;;  %v2753_v34 = vpop.f32.mrb[9].mxu1  ;;  %v1478_v38 = vsel %vm1468_vm1, %v1086_v32, -inf }
 0x246   :  { %v1089_v35 = vpop.f32.mrb[10].mxu1 }
 0x247   :  { %v2754_v37 = vpop.f32.mrb[11].mxu1 }
 0x248   :  { %1479 = vmax.xlane.f32.xlu1 %v1478_v38 }
 0x262   :  { %v3765_v39 = vpop.f32.mrb[12].mxu0 }
 0x263   :  { %v2773_v40 = vpop.f32.mrb[13].mxu0  ;;  %v1481_v41 = vsel %vm1468_vm1, %v3765_v39, -inf }
 0x264   :  { %1482 = vmax.xlane.f32.xlu0 %v1481_v41  ;;  %v1183_v42 = vpop.f32.mrb[14].mxu0  ;;  %v1274_v43 = vpop.f32.mrb[12].mxu1 }
 0x265   :  { %v2774_v44 = vpop.f32.mrb[15].mxu0  ;;  %v2793_v45 = vpop.f32.mrb[13].mxu1  ;;  %v1484_v46 = vsel %vm1468_vm1, %v1274_v43, -inf }
 0x266   :  { %1485 = vmax.xlane.f32.xlu1 %v1484_v46  ;;  %v1277_v47 = vpop.f32.mrb[14].mxu1 }
 0x267   :  { %v2794_v48 = vpop.f32.mrb[15].mxu1  ;;  %v1567_v47 = vld [vmem:[%s4005_s3 + $0x8] sm:$0xf] }
 0x282   :  { %v3770_v49 = vpop.f32.mrb[16].mxu0 }
 0x283   :  { %v2813_v50 = vpop.f32.mrb[17].mxu0  ;;  %v1487_v51 = vsel %vm1468_vm1, %v3770_v49, -inf }
 0x284   :  { %1488 = vmax.xlane.f32.xlu0 %v1487_v51  ;;  %v1371_v52 = vpop.f32.mrb[18].mxu0  ;;  %v3774_v53 = vpop.f32.mrb[16].mxu1  ;;  %v1671_v50 = vsel %vm1577_vm2, %v1567_v47, 0  ;;  %v3072_v47 = vld [vmem:[%s4010_s8 + $0x14] ss:$8 sps:$4 sm:$0xff]  }
 0x285   :  { %v2814_v54 = vpop.f32.mrb[19].mxu0  ;;  %v2833_v55 = vpop.f32.mrb[17].mxu1  ;;  %v1490_v56 = vsel %vm1468_vm1, %v3774_v53, -inf  ;;  %v1568_v52 = vld [vmem:[%s4005_s3 + $0xc] sm:$0xf] }
 0x286   :  { %1491 = vmax.xlane.f32.xlu1 %v1490_v56  ;;  %v1465_v57 = vpop.f32.mrb[18].mxu1  ;;  %v1717_v55 = vsel %vm1577_vm2, %v1568_v52, 0  ;;  %v3076_v52 = vld [vmem:[%s4010_s8 + $0x30] ss:$8 sps:$4 sm:$0xff]  }
 0x287   :  { %v2834_v58 = vpop.f32.mrb[19].mxu1 }
 0x2b1   :  { %v1471_v59 = vpop.xlane.xlu0 %1470 }
 0x2b2   :  { %v1493_v60 = vsub.f32 %v804_v15, %v1471_v59  ;;  %v1569_v59 = vld [vmem:[%s4005_s3 + $0x10] sm:$0xf] }
 0x2b4   :  { %v1501_v61 = vmul.f32 1.442695, %v1493_v60 }
 0x2b5   :  { %v1474_v62 = vpop.xlane.xlu0 %1473 }
 0x2b6   :  { %3101 = vpow2.f32 %v1501_v61  ;;  %v1494_v0 = vsub.f32 %v898_v19, %v1474_v62  ;;  %v1763_v62 = vsel %vm1577_vm2, %v1569_v59, 0 }
 0x2b8   :  { %v1503_v1 = vmul.f32 1.442695, %v1494_v0 }
 0x2ba   :  { %3103 = vpow2.f32 %v1503_v1  ;;  %v1570_v1 = vld [vmem:[%s4005_s3 + $0x14] sm:$0xf] }
 0x2c0   :  { %v3778_v2 = vpop.eup %3101 }
 0x2c1   :  { %v1517_v3 = vsel %vm1468_vm1, %v3778_v2, 0.0 }
 0x2c2   :  { %1518 = vadd.xlane.f32.xlu0 %v1517_v3 }
 0x2c4   :  { %v3782_v36 = vpop.eup %3103 }
 0x2c5   :  { %v1520_v5 = vsel %vm1468_vm1, %v3782_v36, 0.0 }
 0x2c6   :  { %1521 = vadd.xlane.f32.xlu1 %v1520_v5 }
 0x2d1   :  { %v1477_v6 = vpop.xlane.xlu1 %1476 }
 0x2d2   :  { %v1495_v7 = vsub.f32 %v992_v28, %v1477_v6 }
 0x2d4   :  { %v1505_v8 = vmul.f32 1.442695, %v1495_v7 }
 0x2d5   :  { %v1480_v9 = vpop.xlane.xlu1 %1479 }
 0x2d6   :  { %3105 = vpow2.f32 %v1505_v8  ;;  %v1496_v10 = vsub.f32 %v1086_v32, %v1480_v9  ;;  %v1571_v8 = vld [vmem:[%s4005_s3 + $0x18] sm:$0xf] }
 0x2d7   :  { %v1855_v14 = vsel %vm1577_vm2, %v1571_v8, 0 }
 0x2d8   :  { %v1507_v11 = vmul.f32 1.442695, %v1496_v10 }
 0x2da   :  { %3107 = vpow2.f32 %v1507_v11  ;;  %v1572_v11 = vld [vmem:[%s4005_s3 + $0x1c] sm:$0xf] }
 0x2db   :  { %v1901_v16 = vsel %vm1577_vm2, %v1572_v11, 0 }
 0x2e0   :  { %v3794_v15 = vpop.eup %3105 }
 0x2e1   :  { %v1523_v17 = vsel %vm1468_vm1, %v3794_v15, 0.0 }
 0x2e2   :  { %1524 = vadd.xlane.f32.xlu0 %v1523_v17 }
 0x2e4   :  { %v3800_v18 = vpop.eup %3107 }
 0x2e5   :  { %v1526_v19 = vsel %vm1468_vm1, %v3800_v18, 0.0 }
 0x2e6   :  { %1527 = vadd.xlane.f32.xlu1 %v1526_v19 }
 0x2f1   :  { %v1483_v20 = vpop.xlane.xlu0 %1482 }
 0x2f2   :  { %v1497_v23 = vsub.f32 %v3765_v39, %v1483_v20 }
 0x2f3   :  { %v1486_v25 = vpop.xlane.xlu1 %1485 }
 0x2f4   :  { %v1509_v26 = vmul.f32 1.442695, %v1497_v23  ;;  %v1498_v27 = vsub.f32 %v1274_v43, %v1486_v25 }
 0x2f6   :  { %3109 = vpow2.f32 %v1509_v26  ;;  %v1511_v28 = vmul.f32 1.442695, %v1498_v27 }
 0x2f8   :  { %3111 = vpow2.f32 %v1511_v28  ;;  %v3051_v28 = vld [vmem:[%s4008_s6 + $0x40] sm:$0xff]  }
 0x300   :  { %v3805_v29 = vpop.eup %3109 }
 0x301   :  { %v1529_v30 = vsel %vm1468_vm1, %v3805_v29, 0.0 }
 0x302   :  { %v3809_v31 = vpop.eup %3111  ;;  %1530 = vadd.xlane.f32.xlu0 %v1529_v30  ;;  %v3053_v30 = vld [vmem:[%s4008_s6 + $0x48] sm:$0xff]  }
 0x303   :  { %v1532_v32 = vsel %vm1468_vm1, %v3809_v31, 0.0 }
 0x304   :  { %1533 = vadd.xlane.f32.xlu1 %v1532_v32  ;;  %v3055_v32 = vld [vmem:[%s4008_s6 + $0x50] sm:$0xff]  }
 0x311   :  { %v1489_v33 = vpop.xlane.xlu0 %1488 }
 0x312   :  { %v1499_v34 = vsub.f32 %v3770_v49, %v1489_v33  ;;  %v3056_v33 = vld [vmem:[%s4008_s6 + $0x10] sm:$0xff]  }
 0x313   :  { %v1492_v35 = vpop.xlane.xlu1 %1491 }
 0x314   :  { %v1513_v37 = vmul.f32 1.442695, %v1499_v34  ;;  %v1500_v38 = vsub.f32 %v3774_v53, %v1492_v35  ;;  %v3057_v34 = vld [vmem:[%s4008_s6 + $0x58] sm:$0xff]  }
 0x315   :  { %v3058_v35 = vld [vmem:[%s4008_s6 + $0x18] sm:$0xff]  }
 0x316   :  { %3113 = vpow2.f32 %v1513_v37  ;;  %v1515_v39 = vmul.f32 1.442695, %v1500_v38  ;;  %v3059_v37 = vld [vmem:[%s4008_s6 + $0x60] sm:$0xff]  }
 0x317   :  { %v3060_v38 = vld [vmem:[%s4008_s6 + $0x20] sm:$0xff]  }
 0x318   :  { %3115 = vpow2.f32 %v1515_v39  ;;  %v3061_v39 = vld [vmem:[%s4008_s6 + $0x68] sm:$0xff]  }
 0x320   :  { %v3815_v40 = vpop.eup %3113 }
 0x321   :  { %v1535_v41 = vsel %vm1468_vm1, %v3815_v40, 0.0 }
 0x322   :  { %v3819_v42 = vpop.eup %3115  ;;  %1536 = vadd.xlane.f32.xlu0 %v1535_v41  ;;  %v3063_v41 = vld [vmem:[%s4008_s6 + $0x70] sm:$0xff]  }
 0x323   :  { %v1538_v43 = vsel %vm1468_vm1, %v3819_v42, 0.0 }
 0x324   :  { %1539 = vadd.xlane.f32.xlu1 %v1538_v43  ;;  %v3065_v43 = vld [vmem:[%s4008_s6 + $0x78] sm:$0xff]  }
 0x34f   :  { %v1519_v44 = vpop.xlane.xlu0 %1518 }
 0x350   :  { %3117 = vrcp.f32 %v1519_v44  ;;  %v3066_v44 = vld [vmem:[%s4008_s6 + $0x38] sm:$0xff]  }
 0x353   :  { %v1522_v45 = vpop.xlane.xlu1 %1521 }
 0x354   :  { %3119 = vrcp.f32 %v1522_v45  ;;  %v3067_v45 = vld [vmem:[%s4010_s8] ss:$8 sps:$4 sm:$0xff]  }
 0x35a   :  { %v3118_v46 = vpop.eup %3117 }
 0x35b   :  { %v1542_v48 = vmul.f32 %v3118_v46, %v3778_v2  ;;  %v3069_v46 = vld [vmem:[%s4010_s8 + $0x4] ss:$8 sps:$4 sm:$0xff]  }
 0x35d   :  { %v1557_v49 = vpack.c.bf16 %v1542_v48, %v1542_v48  ;;  %v3070_v48 = vld [vmem:[%s4010_s8 + $0x10] ss:$8 sps:$4 sm:$0xff]  }
 0x35e   :  { %v3120_v51 = vpop.eup %3119 }
 0x35f   :  { %v1544_v53 = vmul.f32 %v3120_v51, %v3782_v36  ;;  %2838 = vmatmul.mubr.msk.bf16.vlgmr.msra.gmra.mrb[20].mxu0 %vm1573_vm3, %v1557_v49  ;;  %v1809_v36 = vsel %vm1577_vm2, %v1570_v1, 0  ;;  %v3075_v49 = vld [vmem:[%s4010_s8 + $0x24] ss:$8 sps:$4 sm:$0xff]   ;;  %v3078_v51 = vld [vmem:[%s4010_s8 + $0x34] ss:$8 sps:$4 sm:$0xff]  }
 0x360   :  { %2848 = vmatpush3.bf16.msra.mxu0 %v1671_v50  ;;  %2849 = vmatprep.mubr.msk.bf16.mxu0 %vm3172_vm0, %v3171_v4  ;;  %v3073_v50 = vld [vmem:[%s4010_s8 + $0x20] ss:$8 sps:$4 sm:$0xff]  }
 0x361   :  { %v1558_v54 = vpack.c.bf16 %v1544_v53, %v1544_v53  ;;  %2859 = vmatprep.subr.bf16.mxu0 %v3171_v4 }
 0x363   :  { %2844 = vmatmul.mubr.msk.bf16.vlgmr.msra.gmra.mrb[20].mxu1 %vm1573_vm3, %v1558_v54 }
 0x364   :  { %2854 = vmatpush3.bf16.msra.mxu1 %v1717_v55  ;;  %2855 = vmatprep.mubr.msk.bf16.mxu1 %vm3172_vm0, %v3171_v4 }
 0x365   :  { %2865 = vmatprep.subr.bf16.mxu1 %v3171_v4 }
 0x36f   :  { %v1525_v56 = vpop.xlane.xlu0 %1524 }
 0x370   :  { %3121 = vrcp.f32 %v1525_v56 }
 0x373   :  { %v1528_v57 = vpop.xlane.xlu1 %1527 }
 0x374   :  { %3123 = vrcp.f32 %v1528_v57 }
 0x37a   :  { %v3122_v58 = vpop.eup %3121 }
 0x37b   :  { %v1546_v60 = vmul.f32 %v3122_v58, %v3794_v15 }
 0x37d   :  { %v1559_v61 = vpack.c.bf16 %v1546_v60, %v1546_v60 }
 0x37e   :  { %v3124_v0 = vpop.eup %3123 }
 0x37f   :  { %v1548_v2 = vmul.f32 %v3124_v0, %v3800_v18  ;;  %2850 = vmatmul.mubr.msk.bf16.vlgmr.msra.gmra.mrb[24].mxu0 %vm1573_vm3, %v1559_v61 }
 0x380   :  { %2860 = vmatpush3.bf16.msra.mxu0 %v1763_v62  ;;  %2861 = vmatprep.mubr.msk.bf16.mxu0 %vm3172_vm0, %v3171_v4 }
 0x381   :  { %v1560_v3 = vpack.c.bf16 %v1548_v2, %v1548_v2  ;;  %2871 = vmatprep.subr.bf16.mxu0 %v3171_v4 }
 0x383   :  { %2856 = vmatmul.mubr.msk.bf16.vlgmr.msra.gmra.mrb[24].mxu1 %vm1573_vm3, %v1560_v3 }
 0x384   :  { %2866 = vmatpush3.bf16.msra.mxu1 %v1809_v36  ;;  %2867 = vmatprep.mubr.msk.bf16.mxu1 %vm3172_vm0, %v3171_v4 }
 0x385   :  { %2877 = vmatprep.subr.bf16.mxu1 %v3171_v4 }
 0x38f   :  { %v1531_v5 = vpop.xlane.xlu0 %1530 }
 0x390   :  { %3125 = vrcp.f32 %v1531_v5 }
 0x391   :  { %v1534_v6 = vpop.xlane.xlu1 %1533 }
 0x392   :  { %3127 = vrcp.f32 %v1534_v6 }
 0x39a   :  { %v3126_v7 = vpop.eup %3125 }
 0x39b   :  { %v1550_v9 = vmul.f32 %v3126_v7, %v3805_v29  ;;  %v3052_v29 = vld [vmem:[%s4008_s6] sm:$0xff]  }
 0x39c   :  { %v3128_v10 = vpop.eup %3127 }
 0x39d   :  { %v1552_v12 = vmul.f32 %v3128_v10, %v3809_v31  ;;  %v1561_v13 = vpack.c.bf16 %v1550_v9, %v1550_v9  ;;  %v3054_v31 = vld [vmem:[%s4008_s6 + $0x8] sm:$0xff]  }
 0x39f   :  { %2862 = vmatmul.mubr.msk.bf16.vlgmr.msra.gmra.mrb[28].mxu0 %vm1573_vm3, %v1561_v13  ;;  %v1562_v15 = vpack.c.bf16 %v1552_v12, %v1552_v12 }
 0x3a0   :  { %2872 = vmatpush3.bf16.msra.mxu0 %v1855_v14  ;;  %2873 = vmatprep.mubr.msk.bf16.mxu0 %vm3172_vm0, %v3171_v4 }
 0x3a1   :  { %2868 = vmatmul.mubr.msk.bf16.vlgmr.msra.gmra.mrb[28].mxu1 %vm1573_vm3, %v1562_v15  ;;  %2653 = vmatprep.subr.bf16.mxu0 %v3051_v28 }
 0x3a2   :  { %2878 = vmatpush3.bf16.msra.mxu1 %v1901_v16  ;;  %2879 = vmatprep.mubr.msk.bf16.mxu1 %vm3172_vm0, %v3171_v4 }
 0x3a3   :  { %2268 = vmatprep.subr.bf16.mxu1 %v3069_v46  ;;  %v3090_v46 = vld [vmem:[%s4010_s8 + $0x74] ss:$8 sps:$4 sm:$0xff]  }
 0x3af   :  { %v1537_v17 = vpop.xlane.xlu0 %1536 }
 0x3b0   :  { %3129 = vrcp.f32 %v1537_v17 }
 0x3b1   :  { %v1540_v18 = vpop.xlane.xlu1 %1539 }
 0x3b2   :  { %3131 = vrcp.f32 %v1540_v18 }
 0x3ba   :  { %v3130_v19 = vpop.eup %3129 }
 0x3bb   :  { %v1554_v20 = vmul.f32 %v3130_v19, %v3815_v40  ;;  %v3062_v40 = vld [vmem:[%s4008_s6 + $0x28] sm:$0xff]  }
 0x3bc   :  { %v3132_v23 = vpop.eup %3131 }
 0x3bd   :  { %v1556_v25 = vmul.f32 %v3132_v23, %v3819_v42  ;;  %v1563_v26 = vpack.c.bf16 %v1554_v20, %v1554_v20  ;;  %v3064_v42 = vld [vmem:[%s4008_s6 + $0x30] sm:$0xff]  }
 0x3bf   :  { %2874 = vmatmul.mubr.msk.bf16.vlgmr.msra.gmra.mrb[32].mxu0 %vm1573_vm3, %v1563_v26  ;;  %v1564_v27 = vpack.c.bf16 %v1556_v25, %v1556_v25 }
 0x3c0   :  { %2654 = vmatpush3.bf16.msra.mxu0 %v3052_v29 }
 0x3c1   :  { %2880 = vmatmul.mubr.msk.bf16.vlgmr.msra.gmra.mrb[32].mxu1 %vm1573_vm3, %v1564_v27  ;;  %2655 = vmatprep.subr.bf16.mxu0 %v3053_v30 }
 0x3c2   :  { %2269 = vmatpush1.bf16.msra.mxu1 %v3067_v45  ;;  %v3085_v45 = vld [vmem:[%s4010_s8 + $0x60] ss:$8 sps:$4 sm:$0xff]  }
 0x3c3   :  { %2270 = vmatprep.subr.bf16.mxu1 %v3072_v47  ;;  %v3088_v47 = vld [vmem:[%s4010_s8 + $0x70] ss:$8 sps:$4 sm:$0xff]  }
 0x3c4   :  { %2656 = vmatpush3.bf16.msra.mxu0 %v3054_v31 }
 0x3c5   :  { %2657 = vmatprep.subr.bf16.mxu0 %v3055_v32 }
 0x3c6   :  { %2271 = vmatpush1.bf16.msra.mxu1 %v3070_v48  ;;  %v3174_v48 = vmov 0  }
 0x3c7   :  { %2272 = vmatprep.subr.bf16.mxu1 %v3075_v49  ;;  %2300 = vmatprep.mubr.bf16.mxu1 %v3174_v48 }
 0x3c8   :  { %2658 = vmatpush3.bf16.msra.mxu0 %v3056_v33  ;;  %2889 = vset.pattern.permute.xlu1 %v3174_v48 }
 0x3c9   :  { %2659 = vmatprep.subr.bf16.mxu0 %v3057_v34  ;;  %2890 = vset.pattern.permute.xlu0 %v3174_v48 }
 0x3ca   :  { %2273 = vmatpush1.bf16.msra.mxu1 %v3073_v50  ;;  %v2532_v50 = vld [vmem:[%s4009_s7] ss:$0 sm:$0xff]  ;;  %s3176_s7 = smov [#allocation5]  }
 0x3cb   :  { %2274 = vmatprep.subr.bf16.mxu1 %v3078_v51 }
 0x3cc   :  { %2660 = vmatpush3.bf16.msra.mxu0 %v3058_v35 }
 0x3cd   :  { %2661 = vmatprep.subr.bf16.mxu0 %v3059_v37 }
 0x3ce   :  { %2275 = vmatpush1.bf16.msra.mxu1 %v3076_v52 }
 0x3d0   :  { %2662 = vmatpush3.bf16.msra.mxu0 %v3060_v38 }
 0x3d1   :  { %2663 = vmatprep.subr.bf16.mxu0 %v3061_v39 }
 0x3d4   :  { %2664 = vmatpush3.bf16.msra.mxu0 %v3062_v40 }
 0x3d5   :  { %2665 = vmatprep.subr.bf16.mxu0 %v3063_v41  ;;  %v3081_v41 = vld [vmem:[%s4010_s8 + $0x44] ss:$8 sps:$4 sm:$0xff]  }
 0x3d6   :  { %2276 = vmatprep.subr.bf16.mxu1 %v3081_v41 }
 0x3d8   :  { %2666 = vmatpush3.bf16.msra.mxu0 %v3064_v42  ;;  %v3079_v42 = vld [vmem:[%s4010_s8 + $0x40] ss:$8 sps:$4 sm:$0xff]  }
 0x3d9   :  { %2667 = vmatprep.subr.bf16.mxu0 %v3065_v43  ;;  %2277 = vmatpush1.bf16.msra.mxu1 %v3079_v42  ;;  %v3084_v43 = vld [vmem:[%s4010_s8 + $0x54] ss:$8 sps:$4 sm:$0xff]  }
 0x3da   :  { %2278 = vmatprep.subr.bf16.mxu1 %v3084_v43 }
 0x3dc   :  { %2668 = vmatpush3.bf16.msra.mxu0 %v3066_v44  ;;  %v3082_v44 = vld [vmem:[%s4010_s8 + $0x50] ss:$8 sps:$4 sm:$0xff]  }
 0x3dd   :  { %2279 = vmatpush1.bf16.msra.mxu1 %v3082_v44 }
 0x432   :  { %v1615_v53 = vpop.f32.mrb[20].mxu0 }
 0x433   :  { %v2839_v54 = vpop.f32.mrb[21].mxu0 }
 0x434   :  { %v1618_v55 = vpop.f32.mrb[22].mxu0 }
 0x435   :  { %v2840_v56 = vpop.f32.mrb[23].mxu0 }
 0x436   :  { %v1661_v57 = vpop.f32.mrb[20].mxu1 }
 0x437   :  { %v1951_v58 = vrot.slane %v1661_v57, 7  ;;  %v2845_v59 = vpop.f32.mrb[21].mxu1 }
 0x438   :  { %v1664_v60 = vpop.f32.mrb[22].mxu1  ;;  %v2176_v59 = vld [vmem:[%s4011_s9] sm:$0x3]  ;;  %s2375_s9 = sshll.u32 %s3176_s7, 4  ;;  %s2376_s9 = int_to_ptr.vmem [resolvable:$true] %s2375_s9 }
 0x439   :  { %v1953_v61 = vsel %vm1952_vm4, %v1951_v58, %v1615_v53  ;;  %v2846_v62 = vpop.f32.mrb[23].mxu1  ;;  %v3175_v58 = vmov -inf   ;;  %v2181_v60 = vrot.slane %v2176_v59, %v3512_v22  ;;  %s3147_s6 = scalar_lea.vmem %s2376_s9, 256  ;;  %p3152_p1 = scmp.lt.s32.totalorder %s2376_s9, %s2376_s9 }
 0x43a   :  { %2152 = vst.msk [vmem:[#allocation3] sm:$0xff] %vm2151_vm11, %v3175_v58  ;;  %p3148_p0 = scmp.ne.s32.totalorder %s2376_s9, %s3147_s6  ;;  %p3153_p2 = scmp.lt.s32.totalorder %s3147_s6, %s3147_s6 }
 0x43c   :  { %p3154_p3 = por %p3153_p2, %p3152_p1 }
 0x43e   :  { %p3155_p4 = pnand %p3154_p3, %p3148_p0 }
 0x452   :  { %v1707_v0 = vpop.f32.mrb[24].mxu0 }
 0x453   :  { %v1954_v1 = vrot.slane %v1707_v0, 6  ;;  %v2851_v2 = vpop.f32.mrb[25].mxu0 }
 0x454   :  { %v1710_v3 = vpop.f32.mrb[26].mxu0 }
 0x455   :  { %v1956_v36 = vsel %vm1955_vm5, %v1954_v1, %v1953_v61  ;;  %v2852_v5 = vpop.f32.mrb[27].mxu0  ;;  %v2185_v61 = vrot.slane %v2176_v59, %v118_v24 }
 0x456   :  { %v1753_v6 = vpop.f32.mrb[24].mxu1 }
 0x457   :  { %v1957_v7 = vrot.slane %v1753_v6, 5  ;;  %v2857_v8 = vpop.f32.mrb[25].mxu1  ;;  %v2313_v6 = vld [vmem:[#allocation3] sm:$0xff] }
 0x458   :  { %v1756_v9 = vpop.f32.mrb[26].mxu1 }
 0x459   :  { %v1959_v10 = vsel %vm1958_vm6, %v1957_v7, %v1956_v36  ;;  %v2858_v11 = vpop.f32.mrb[27].mxu1 }
 0x472   :  { %v1799_v12 = vpop.f32.mrb[28].mxu0 }
 0x473   :  { %v1960_v13 = vrot.slane %v1799_v12, 4  ;;  %v2863_v14 = vpop.f32.mrb[29].mxu0 }
 0x474   :  { %v1802_v15 = vpop.f32.mrb[30].mxu0  ;;  %v1845_v16 = vpop.f32.mrb[28].mxu1 }
 0x475   :  { %v1962_v17 = vsel %vm1961_vm7, %v1960_v13, %v1959_v10  ;;  %v1963_v18 = vrot.slane %v1845_v16, 3  ;;  %v2864_v19 = vpop.f32.mrb[31].mxu0  ;;  %v2869_v20 = vpop.f32.mrb[29].mxu1 }
 0x476   :  { %v1848_v23 = vpop.f32.mrb[30].mxu1 }
 0x477   :  { %v1965_v25 = vsel %vm1964_vm8, %v1963_v18, %v1962_v17  ;;  %v2870_v26 = vpop.f32.mrb[31].mxu1  ;;  %v2318_v17 = vld [vmem:[#allocation4] sm:$0xff] }
 0x492   :  { %v1891_v27 = vpop.f32.mrb[32].mxu0 }
 0x493   :  { %v1966_v28 = vrot.slane %v1891_v27, 2  ;;  %v2875_v29 = vpop.f32.mrb[33].mxu0 }
 0x494   :  { %v1894_v30 = vpop.f32.mrb[34].mxu0  ;;  %v1937_v31 = vpop.f32.mrb[32].mxu1 }
 0x495   :  { %v1968_v32 = vsel %vm1967_vm9, %v1966_v28, %v1965_v25  ;;  %v1969_v33 = vrot.slane %v1937_v31, 1  ;;  %v2876_v34 = vpop.f32.mrb[35].mxu0  ;;  %v2881_v35 = vpop.f32.mrb[33].mxu1 }
 0x496   :  { %v1940_v37 = vpop.f32.mrb[34].mxu1 }
 0x497   :  { %v2882_v38 = vpop.f32.mrb[35].mxu1  ;;  %v1971_v39 = vsel %vm1970_vm10, %v1969_v33, %v1968_v32 }
 0x498   :  { %v1973_v40 = vpack.c.bf16 %v1971_v39, %v1971_v39 }
 0x49a   :  { %2141 = vmatprep.mubr.bf16.mxu0 %v1973_v40 }
 0x49b   :  { %2142 = vmatmul.mubr.bf16.vlgmr.msra.gmra.mrb[36].mxu0 %v3528_v63  ;;  %v3087_v63 = vld [vmem:[%s4010_s8 + $0x64] ss:$8 sps:$4 sm:$0xff]  }
 0x49c   :  { %2280 = vmatprep.subr.bf16.mxu1 %v3087_v63 }
 0x49d   :  { %2281 = vmatpush1.bf16.msra.mxu1 %v3085_v45 }
 0x49e   :  { %2282 = vmatprep.subr.bf16.mxu1 %v3090_v46 }
 0x4a1   :  { %2283 = vmatpush1.bf16.msra.mxu1 %v3088_v47 }
 0x56e   :  { %v2669_v49 = vpop.f32.mrb[36].mxu0 }
 0x56f   :  { %v2670_v51 = vpop.f32.mrb[37].mxu0 }
 0x570   :  { %v2671_v52 = vadd.f32 %v2670_v51, %v2669_v49  ;;  %v2672_v53 = vpop.f32.mrb[38].mxu0 }
 0x571   :  { %v2673_v54 = vpop.f32.mrb[39].mxu0 }
 0x572   :  { %v2144_v55 = vadd.f32 %v2671_v52, %v2532_v50 }
 0x574   :  { %3133 = vtanh.f32 %v2144_v55 }
 0x57e   :  { %v3134_v56 = vpop.eup %3133 }
 0x57f   :  { %v2156_v57 = vpack.c.bf16 %v3134_v56, %v3134_v56 }
 0x581   :  { %2301 = vmatmul.mubr.bf16.vlgmr.msra.gmra.mrb[36].mxu1 %v2156_v57 }
 0x654   :  { %v2302_v62 = vpop.f32.mrb[36].mxu1 }
 0x655   :  { %v2303_v0 = vadd.f32 %v2302_v62, %v2181_v60  ;;  %v2304_v1 = vpop.f32.mrb[37].mxu1 }
 0x656   :  { %v2305_v2 = vadd.f32 %v2304_v1, %v2185_v61  ;;  %v2306_v3 = vpop.f32.mrb[38].mxu1 }
 0x657   :  { %v2307_v36 = vpop.f32.mrb[39].mxu1 }
 0x658   :  { %v2314_v5 = vmax.f32 %v2303_v0, %v2305_v2 }
 0x65a   :  { %2315 = vmax.xlane.f32.xlu0 %v2314_v5 }
 0x6e7   :  { %v2316_v7 = vpop.xlane.xlu0 %2315 }
 0x6e8   :  { %v2317_v4 = vmax.f32 %v2313_v6, %v2316_v7 }
 0x6ea   :  { %v2319_v8 = vsub.f32 %v2313_v6, %v2317_v4  ;;  %2340 = vst.msk [vmem:[#allocation3] sm:$0xff] %vm2151_vm11, %v2317_v4  ;;  %2325 = vperm.xlu1 %2889, %v2317_v4  }
 0x6ec   :  { %v2320_v15 = vmul.f32 1.442695, %v2319_v8 }
 0x6f1   :  { %v2346_v14 = vld [vmem:[#allocation3] sm:$0xff] }
 0x769   :  { %v2326_v9 = vpop.permute.xlu1 %2325 }
 0x76a   :  { %v2328_v22 = vsub.f32 %v2303_v0, %v2326_v9  ;;  %v2329_v10 = vsub.f32 %v2305_v2, %v2326_v9 }
 0x76c   :  { %v2330_v21 = vmul.f32 1.442695, %v2328_v22  ;;  %v2332_v24 = vmul.f32 1.442695, %v2329_v10 }
 0x76e   :  { %3135 = vpow2.f32 %v2330_v21 }
 0x76f   :  { %3137 = vpow2.f32 %v2332_v24 }
 0x770   :  { %3139 = vpow2.f32 %v2320_v15 }
 0x778   :  { %v3136_v11 = vpop.eup %3135 }
 0x779   :  { %v3138_v12 = vpop.eup %3137 }
 0x77a   :  { %v2334_v13 = vadd.f32 %v3138_v12, %v3136_v11  ;;  %v3140_v16 = vpop.eup %3139 }
 0x77b   :  { %v2322_v18 = vmul.f32 %v3140_v16, %v2318_v17 }
 0x77c   :  { %2335 = vadd.xlane.f32.xlu0 %v2334_v13 }
 0x792   :  { %2349 = vperm.xlu0 %2890, %v2346_v14  }
 0x809   :  { %v2336_v19 = vpop.xlane.xlu0 %2335 }
 0x80a   :  { %v2337_v20 = vadd.f32 %v2336_v19, %v2322_v18 }
 0x80c   :  { %2339 = vst.msk [vmem:[#allocation4] sm:$0xff] %vm2151_vm11, %v2337_v20 }
 0x811   :  { %v2350_v25 = vpop.permute.xlu0 %2349 }
 0x812   :  { %v2352_v26 = vsub.f32 %v2303_v0, %v2350_v25  ;;  %v2353_v27 = vsub.f32 %v2305_v2, %v2350_v25 }
 0x813   :  { %v2358_v23 = vld [vmem:[#allocation4] sm:$0xff] }
 0x814   :  { %2361 = vperm.xlu1 %2889, %v2358_v23   ;;  %v2354_v28 = vmul.f32 1.442695, %v2352_v26  ;;  %v2356_v29 = vmul.f32 1.442695, %v2353_v27 }
 0x816   :  { %3141 = vpow2.f32 %v2354_v28 }
 0x817   :  { %3143 = vpow2.f32 %v2356_v29 }
 0x820   :  { %v3142_v31 = vpop.eup %3141 }
 0x821   :  { %v3144_v32 = vpop.eup %3143 }
 0x893   :  { %v2362_v30 = vpop.permute.xlu1 %2361 }
 0x894   :  { %3145 = vrcp.f32 %v2362_v30 }
 0x89e   :  { %v3146_v33 = vpop.eup %3145 }
 0x89f   :  { %v2365_v34 = vmul.f32 %v3146_v33, %v3142_v31  ;;  %v2366_v35 = vmul.f32 %v3146_v33, %v3144_v32 }
 0x8a1   :  { %2367 = vst [vmem:[#allocation5] sm:$0xff] %v2365_v34  ;;  %2368 = vst [vmem:[#allocation5 + $0x8] sm:$0xff] %v2366_v35 }
 0x8a2   :  { %3158 = shalt.err (!%p3155_p4)
}
 0x8a3   :  { %s3159_s27 = scalar_lea.hbm %s4012_s10, 256 }
 0x8a4   :  { %p3160_p5 = scmp.ne.s32.totalorder %s4012_s10, %s3159_s27  ;;  %p3163_p6 = scmp.lt.u32.totalorder %s3159_s27, %s4012_s10 }
 0x8a6   :  { %p3165_p7 = pnand %p3163_p6, %p3160_p5 }
 0x8a8   :  { %3168 = shalt.err (!%p3165_p7)
}
 0x8a9   :  { %2378 = dma.vmem_to_hbm [thread:$0]  %s2376_s9, 256, %s4012_s10, [#allocation6]  }
 0x8aa   :  { %3169 = dma.done.wait [#allocation6], 256  }
 0x8ab   :  { %3170 = vsyncadd [#allocation6], 4294967040 }
 0x8ac   :  { %2386 = vsyncpa [#allocation6], 1 }

</bundles_post_ra>
